<compile_context>
chip_gen: v7x
topology: tpu7x:2x2x1
jax: 0.10.0
libtpu: 0.0.40
codegen_flags: <defaults>
</compile_context>

<pallas_src>
import jax
import jax.numpy as jnp
from jax import lax
from jax.experimental import pallas as pl
from jax.experimental.pallas import tpu as pltpu

# ----------------------------- configuration -----------------------------

EMB_DIM_FEAT = 8          # per-WALS-feature embedding dim
MLP_TYPE_DIM = 32         # output dim of per-feature-type MLP
H = 32                    # rnn_size (encoder/decoder hidden & attention dim)
E = 32                    # word embedding dim
SRC_VOCAB = 20
TGT_VOCAB = 20

FEATURE_TYPES = [
    ("Phonology",   ["F1", "F2"]),
    ("Morphology",  ["F3", "F4"]),
    ("NominalCat",  ["F5", "F6"]),
    ("WordOrder",   ["F7", "F8"]),
]
FEATURE_VOCAB = 6
SIMULATION_LANGUAGES = ("lang_src", "lang_tgt")


def flip_simulation_languages(sim_langs, flip):
    if flip:
        sim_langs[0], sim_langs[1] = sim_langs[1], sim_langs[0]
    return sim_langs


# ----------------------------- fused Pallas kernel -----------------------------

def _softmax_last(x):
    m = jnp.max(x, axis=-1, keepdims=True)
    e = jnp.exp(x - m)
    return e / jnp.sum(e, axis=-1, keepdims=True)


def _fused_kernel(len_ref,                                   # scalar prefetch (SMEM)
                  src_ref, tgt_ref, wals_ref,
                  wih_e_ref, whh_e_ref, be_ref,
                  wih_d_ref, whh_d_ref, bd_ref,
                  wcat_ref, bcat_ref,
                  out_ref, attn_ref, attnw_ref, dstate_ref):
    b = pl.program_id(0)

    S = src_ref.shape[1]
    T = tgt_ref.shape[1]
    Hh = whh_e_ref.shape[0]

    x_src = src_ref[0]                 # (S, E)  this batch element, time-major
    x_tgt = tgt_ref[0]                 # (T, E)
    wals = wals_ref[...]               # (Wn, H) shared across batch (broadcast)

    # ---------- encoder RNN (input projection hoisted out of recurrence) ----------
    xp_e = jnp.dot(x_src, wih_e_ref[...],
                   preferred_element_type=jnp.float32) + be_ref[...]   # (S, H)
    whh_e = whh_e_ref[...]
    h = jnp.zeros((1, Hh), jnp.float32)
    ctx_rows = []
    for s in range(S):                 # fully unrolled; h stays in registers
        h = jnp.tanh(xp_e[s:s + 1, :] +
                     jnp.dot(h, whh_e, preferred_element_type=jnp.float32))
        ctx_rows.append(h)
    ctx = jnp.concatenate(ctx_rows, axis=0)                              # (S, H)

    # ---------- decoder RNN, init state = encoder final hidden ----------
    xp_d = jnp.dot(x_tgt, wih_d_ref[...],
                   preferred_element_type=jnp.float32) + bd_ref[...]    # (T, H)
    whh_d = whh_d_ref[...]
    dec_rows = []
    for t in range(T):
        h = jnp.tanh(xp_d[t:t + 1, :] +
                     jnp.dot(h, whh_d, preferred_element_type=jnp.float32))
        dec_rows.append(h)
    dec = jnp.concatenate(dec_rows, axis=0)                              # (T, H)
    dstate_ref[0] = h                                                    # (1, H)

    # ---------- doubly attention: one fused score matmul over [ctx ; wals] ----------
    keys = jnp.concatenate([ctx, wals], axis=0)                          # (S+Wn, H)
    dn = (((1,), (1,)), ((), ()))                                        # contract hidden dim
    scores = lax.dot_general(dec, keys, dn,
                             preferred_element_type=jnp.float32)         # (T, S+Wn)

    s1 = scores[:, :S]                                                   # encoder scores
    s2 = scores[:, S:]                                                   # WALS scores

    # source-length masking (pack_padded_sequence semantics)
    pos = lax.broadcasted_iota(jnp.int32, (T, S), 1)
    s1 = jnp.where(pos < len_ref[b], s1, jnp.float32(-1e30))

    a1 = _softmax_last(s1)                                               # (T, S)
    a2 = _softmax_last(s2)                                               # (T, Wn)

    c1 = jnp.dot(a1, ctx, preferred_element_type=jnp.float32)            # (T, H)
    c2 = jnp.dot(a2, wals, preferred_element_type=jnp.float32)           # (T, H)

    # merged output projection: [c1 | dec | c2] @ [[wc1,0],[wd1,wd2],[0,wc2]] + [b1,b2]
    cat = jnp.concatenate([c1, dec, c2], axis=1)                         # (T, 3H)
    hcat = jnp.tanh(jnp.dot(cat, wcat_ref[...],
                            preferred_element_type=jnp.float32) + bcat_ref[...])  # (T, 2H)

    out_ref[0] = hcat[:, :Hh] + hcat[:, Hh:]     # out + out_wals
    attn_ref[0] = a1                              # "std" attention
    attnw_ref[0] = a2                             # WALS attention


def wals_doubly_attention_pallas(lengths, src_emb, tgt_emb, wals,
                                 wih_e, whh_e, be, wih_d, whh_d, bd,
                                 wcat, bcat):
    """src_emb: (B,S,E), tgt_emb: (B,T,E), wals: (Wn,H) ->
       out (B,T,H), attn (B,T,S), attn_wals (B,T,Wn), dec_state (B,H)."""
    B, S, Ein = src_emb.shape
    T = tgt_emb.shape[1]
    Wn, Hh = wals.shape

    const2 = lambda b, lens: (0, 0)
    grid_spec = pltpu.PrefetchScalarGridSpec(
        num_scalar_prefetch=1,                    # lengths -> SMEM
        grid=(B,),
        in_specs=[
            pl.BlockSpec((1, S, Ein), lambda b, lens: (b, 0, 0)),
            pl.BlockSpec((1, T, Ein), lambda b, lens: (b, 0, 0)),
            pl.BlockSpec((Wn, Hh), const2),
            pl.BlockSpec((Ein, Hh), const2),
            pl.BlockSpec((Hh, Hh), const2),
            pl.BlockSpec((1, Hh), const2),
            pl.BlockSpec((Ein, Hh), const2),
            pl.BlockSpec((Hh, Hh), const2),
            pl.BlockSpec((1, Hh), const2),
            pl.BlockSpec((3 * Hh, 2 * Hh), const2),
            pl.BlockSpec((1, 2 * Hh), const2),
        ],
        out_specs=[
            pl.BlockSpec((1, T, Hh), lambda b, lens: (b, 0, 0)),
            pl.BlockSpec((1, T, S), lambda b, lens: (b, 0, 0)),
            pl.BlockSpec((1, T, Wn), lambda b, lens: (b, 0, 0)),
            pl.BlockSpec((1, 1, Hh), lambda b, lens: (b, 0, 0)),
        ],
    )
    out, attn, attn_w, dstate = pl.pallas_call(
        _fused_kernel,
        grid_spec=grid_spec,
        out_shape=(
            jax.ShapeDtypeStruct((B, T, Hh), jnp.float32),
            jax.ShapeDtypeStruct((B, T, S), jnp.float32),
            jax.ShapeDtypeStruct((B, T, Wn), jnp.float32),
            jax.ShapeDtypeStruct((B, 1, Hh), jnp.float32),
        ),
        compiler_params=pltpu.CompilerParams(
            dimension_semantics=("parallel",)),   # v7x: one batch element per TC
    )(lengths, src_emb, tgt_emb, wals,
      wih_e, whh_e, be, wih_d, whh_d, bd, wcat, bcat)
    return out, attn, attn_w, dstate[:, 0, :]


# ----------------------------- model glue -----------------------------

def get_local_features(params, feature_values, feature_types, sim_langs):
    """WalsDoublyAttentive_Target branch of get_local_features.
    Tiny dense math kept in plain jnp (fused by XLA) instead of many
    micro pallas_call launches."""
    out = {}
    for lang in sim_langs:
        rows = []
        for type_name, feats in feature_types:
            embs = [params["emb_features"][feat][feature_values[lang][feat]].reshape(1, -1)
                    for feat in feats]
            concat = jnp.concatenate(embs, axis=1)             # (1, sum emb dims)
            w, b = params["mlp_feature_types"][type_name]
            rows.append(jnp.tanh(concat @ w + b))              # (1, MLP_TYPE_DIM)
        out[lang] = jnp.concatenate(rows, axis=0)              # (n_types, MLP_TYPE_DIM)
    # Target-only model: use the target language's features
    w, b = params["mlp_target_or_both"]
    return jnp.tanh(out[sim_langs[1]] @ w + b)                 # (n_types, H)


def wals_doubly_attention_forward(params, src, tgt, lengths,
                                  sim_langs=SIMULATION_LANGUAGES, flipping=False):
    wals_features = get_local_features(params, params["feature_values"],
                                       FEATURE_TYPES, sim_langs)
    sim_langs = flip_simulation_languages(list(sim_langs), flipping)

    tgt = tgt[:-1]                                             # drop last token

    # Embedding lookups gathered batch-major to match the kernel layout
    # (no separate transpose ops around the kernel).
    src_emb = params["src_embedding"][src.T]                   # (B, S, E)
    tgt_emb = params["tgt_embedding"][tgt.T]                   # (B, T, E)

    wih_e, whh_e, be = params["encoder_rnn"]
    wih_d, whh_d, bd = params["decoder_rnn"]
    wc1, wd1, b1, wc2, wd2, b2 = params["attn"]

    # Pack the two attention output projections into one matmul:
    # [c1 | d | c2] @ [[wc1, 0], [wd1, wd2], [0, wc2]] + [b1, b2]
    Hh = whh_e.shape[0]
    zero = jnp.zeros((Hh, Hh), jnp.float32)
    wcat = jnp.concatenate([
        jnp.concatenate([wc1, zero], axis=1),
        jnp.concatenate([wd1, wd2], axis=1),
        jnp.concatenate([zero, wc2], axis=1),
    ], axis=0)                                                 # (3H, 2H)
    bcat = jnp.concatenate([b1, b2], axis=1)                   # (1, 2H)

    # wals_features are identical for every batch element (the PyTorch
    # `repeat` over batch); the kernel broadcasts them instead of tiling.
    out_b, attn_b, attn_w_b, dec_state = wals_doubly_attention_pallas(
        lengths.astype(jnp.int32), src_emb, tgt_emb, wals_features,
        wih_e, whh_e, be, wih_d, whh_d, bd, wcat, bcat)

    out_total = jnp.transpose(out_b, (1, 0, 2))                # (T, B, H) = out + out_wals
    attns = {"std": jnp.transpose(attn_b, (1, 0, 2)),          # (T, B, S)
             "wals": jnp.transpose(attn_w_b, (1, 0, 2))}       # (T, B, n_types)
    return out_total, attns, dec_state


# ----------------------------- parameter init -----------------------------

def init_params(key):
    params = {}
    keys = iter(jax.random.split(key, 64))

    def nrm(shape, scale=0.1):
        return scale * jax.random.normal(next(keys), shape, dtype=jnp.float32)

    params["emb_features"] = {
        feat: nrm((FEATURE_VOCAB, EMB_DIM_FEAT))
        for _, feats in FEATURE_TYPES for feat in feats
    }
    params["mlp_feature_types"] = {}
    for type_name, feats in FEATURE_TYPES:
        in_dim = EMB_DIM_FEAT * len(feats)
        params["mlp_feature_types"][type_name] = (
            nrm((in_dim, MLP_TYPE_DIM)), nrm((1, MLP_TYPE_DIM)))
    params["mlp_target_or_both"] = (nrm((MLP_TYPE_DIM, H)), nrm((1, H)))

    params["src_embedding"] = nrm((SRC_VOCAB, E))
    params["tgt_embedding"] = nrm((TGT_VOCAB, E))
    params["encoder_rnn"] = (nrm((E, H)), nrm((H, H)), nrm((1, H)))
    params["decoder_rnn"] = (nrm((E, H)), nrm((H, H)), nrm((1, H)))
    params["attn"] = (nrm((H, H)), nrm((H, H)), nrm((1, H)),
                      nrm((H, H)), nrm((H, H)), nrm((1, H)))

    # Deterministic WALS feature values per simulation language.
    params["feature_values"] = {
        lang: {feat: (i + li) % FEATURE_VOCAB
               for i, feat in enumerate(f for _, fs in FEATURE_TYPES for f in fs)}
        for li, lang in enumerate(SIMULATION_LANGUAGES)
    }
    return params


# ----------------------------- main -----------------------------

if __name__ == "__main__":
    key = jax.random.PRNGKey(0)
    params = init_params(key)

    B = 2
    S_SRC = 16
    S_TGT = 9   # tgt[:-1] -> 8 decoding steps

    k1, k2 = jax.random.split(jax.random.PRNGKey(0))
    src = jax.random.randint(k1, (S_SRC, B), 0, SRC_VOCAB, dtype=jnp.int32)
    tgt = jax.random.randint(k2, (S_TGT, B), 0, TGT_VOCAB, dtype=jnp.int32)
    lengths = jnp.full((B,), S_SRC, dtype=jnp.int32)

    forward = jax.jit(wals_doubly_attention_forward,
                      static_argnames=("sim_langs", "flipping"))

    out_total, attns, dec_state = forward(
        params, src, tgt, lengths,
        sim_langs=SIMULATION_LANGUAGES, flipping=False)

    jax.block_until_ready((out_total, attns["std"], attns["wals"], dec_state))

    assert out_total.shape == (S_TGT - 1, B, H)
    assert attns["std"].shape == (S_TGT - 1, B, S_SRC)
    assert attns["wals"].shape == (S_TGT - 1, B, len(FEATURE_TYPES))
    assert dec_state.shape == (B, H)
    print("KERNEL_OK")
</pallas_src>

<mosaic_0001>
module attributes {stable_mosaic.version = 11 : i64} {
  func.func @_fused_kernel(%arg0: i32, %arg1: memref<2xi32, #tpu.memory_space<smem>>, %arg2: memref<1x16x32xf32, #tpu.memory_space<vmem>>, %arg3: memref<1x8x32xf32, #tpu.memory_space<vmem>>, %arg4: memref<4x32xf32, #tpu.memory_space<vmem>>, %arg5: memref<32x32xf32, #tpu.memory_space<vmem>>, %arg6: memref<32x32xf32, #tpu.memory_space<vmem>>, %arg7: memref<1x32xf32, #tpu.memory_space<vmem>>, %arg8: memref<32x32xf32, #tpu.memory_space<vmem>>, %arg9: memref<32x32xf32, #tpu.memory_space<vmem>>, %arg10: memref<1x32xf32, #tpu.memory_space<vmem>>, %arg11: memref<96x64xf32, #tpu.memory_space<vmem>>, %arg12: memref<1x64xf32, #tpu.memory_space<vmem>>, %arg13: memref<1x8x32xf32, #tpu.memory_space<vmem>>, %arg14: memref<1x8x16xf32, #tpu.memory_space<vmem>>, %arg15: memref<1x8x4xf32, #tpu.memory_space<vmem>>, %arg16: memref<1x1x32xf32, #tpu.memory_space<vmem>>) attributes {dimension_semantics = [#tpu.dimension_semantics<parallel>], iteration_bounds = array<i64: 2>, scalar_prefetch = 1 : i64, scratch_operands = 0 : i64, tpu.core_type = #tpu.core_type<tc>, window_params = [{transform_indices = @transform_0, window_bounds = array<i64: 1, 16, 32>}, {transform_indices = @transform_1, window_bounds = array<i64: 1, 8, 32>}, {pipeline_mode = #tpu.pipeline_mode<synchronous>, transform_indices = @transform_2, window_bounds = array<i64: 4, 32>}, {pipeline_mode = #tpu.pipeline_mode<synchronous>, transform_indices = @transform_3, window_bounds = array<i64: 32, 32>}, {pipeline_mode = #tpu.pipeline_mode<synchronous>, transform_indices = @transform_4, window_bounds = array<i64: 32, 32>}, {pipeline_mode = #tpu.pipeline_mode<synchronous>, transform_indices = @transform_5, window_bounds = array<i64: 1, 32>}, {pipeline_mode = #tpu.pipeline_mode<synchronous>, transform_indices = @transform_6, window_bounds = array<i64: 32, 32>}, {pipeline_mode = #tpu.pipeline_mode<synchronous>, transform_indices = @transform_7, window_bounds = array<i64: 32, 32>}, {pipeline_mode = #tpu.pipeline_mode<synchronous>, transform_indices = @transform_8, window_bounds = array<i64: 1, 32>}, {pipeline_mode = #tpu.pipeline_mode<synchronous>, transform_indices = @transform_9, window_bounds = array<i64: 96, 64>}, {pipeline_mode = #tpu.pipeline_mode<synchronous>, transform_indices = @transform_10, window_bounds = array<i64: 1, 64>}, {transform_indices = @transform_11, window_bounds = array<i64: 1, 8, 32>}, {transform_indices = @transform_12, window_bounds = array<i64: 1, 8, 16>}, {transform_indices = @transform_13, window_bounds = array<i64: 1, 8, 4>}, {transform_indices = @transform_14, window_bounds = array<i64: 1, 1, 32>}]} {
    %c0 = arith.constant 0 : index
    %c0_0 = arith.constant 0 : index
    %c0_1 = arith.constant 0 : index
    %0 = vector.load %arg2[%c0, %c0_0, %c0_1] : memref<1x16x32xf32, #tpu.memory_space<vmem>>, vector<1x16x32xf32>
    %1 = vector.shape_cast %0 : vector<1x16x32xf32> to vector<16x32xf32>
    %c0_2 = arith.constant 0 : index
    %c0_3 = arith.constant 0 : index
    %c0_4 = arith.constant 0 : index
    %2 = vector.load %arg3[%c0_2, %c0_3, %c0_4] : memref<1x8x32xf32, #tpu.memory_space<vmem>>, vector<1x8x32xf32>
    %3 = vector.shape_cast %2 : vector<1x8x32xf32> to vector<8x32xf32>
    %c0_5 = arith.constant 0 : index
    %c0_6 = arith.constant 0 : index
    %4 = vector.load %arg4[%c0_5, %c0_6] : memref<4x32xf32, #tpu.memory_space<vmem>>, vector<4x32xf32>
    %c0_7 = arith.constant 0 : index
    %c0_8 = arith.constant 0 : index
    %5 = vector.load %arg5[%c0_7, %c0_8] : memref<32x32xf32, #tpu.memory_space<vmem>>, vector<32x32xf32>
    %cst = arith.constant dense<0.000000e+00> : vector<16x32xf32>
    %6 = tpu.matmul %1, %5, %cst {dimension_numbers = #tpu.dot_dimension_numbers<[1], [0], [0], [1], [0, 0, 1, 1], [], []>} : vector<16x32xf32>, vector<32x32xf32>, vector<16x32xf32> -> vector<16x32xf32>
    %c0_9 = arith.constant 0 : index
    %c0_10 = arith.constant 0 : index
    %7 = vector.load %arg7[%c0_9, %c0_10] : memref<1x32xf32, #tpu.memory_space<vmem>>, vector<1x32xf32>
    %8 = vector.broadcast %7 : vector<1x32xf32> to vector<16x32xf32>
    %9 = arith.addf %6, %8 : vector<16x32xf32>
    %c0_11 = arith.constant 0 : index
    %c0_12 = arith.constant 0 : index
    %10 = vector.load %arg6[%c0_11, %c0_12] : memref<32x32xf32, #tpu.memory_space<vmem>>, vector<32x32xf32>
    %cst_13 = arith.constant 0.000000e+00 : f32
    %11 = vector.broadcast %cst_13 : f32 to vector<1x32xf32>
    %12 = vector.extract_strided_slice %9 {offsets = [0, 0], sizes = [1, 32], strides = [1, 1]} : vector<16x32xf32> to vector<1x32xf32>
    %cst_14 = arith.constant dense<0.000000e+00> : vector<1x32xf32>
    %13 = tpu.matmul %11, %10, %cst_14 {dimension_numbers = #tpu.dot_dimension_numbers<[1], [0], [0], [1], [0, 0, 1, 1], [], []>} : vector<1x32xf32>, vector<32x32xf32>, vector<1x32xf32> -> vector<1x32xf32>
    %14 = arith.addf %12, %13 : vector<1x32xf32>
    %15 = math.tanh %14 : vector<1x32xf32>
    %16 = vector.extract_strided_slice %9 {offsets = [1, 0], sizes = [1, 32], strides = [1, 1]} : vector<16x32xf32> to vector<1x32xf32>
    %cst_15 = arith.constant dense<0.000000e+00> : vector<1x32xf32>
    %17 = tpu.matmul %15, %10, %cst_15 {dimension_numbers = #tpu.dot_dimension_numbers<[1], [0], [0], [1], [0, 0, 1, 1], [], []>} : vector<1x32xf32>, vector<32x32xf32>, vector<1x32xf32> -> vector<1x32xf32>
    %18 = arith.addf %16, %17 : vector<1x32xf32>
    %19 = math.tanh %18 : vector<1x32xf32>
    %20 = vector.extract_strided_slice %9 {offsets = [2, 0], sizes = [1, 32], strides = [1, 1]} : vector<16x32xf32> to vector<1x32xf32>
    %cst_16 = arith.constant dense<0.000000e+00> : vector<1x32xf32>
    %21 = tpu.matmul %19, %10, %cst_16 {dimension_numbers = #tpu.dot_dimension_numbers<[1], [0], [0], [1], [0, 0, 1, 1], [], []>} : vector<1x32xf32>, vector<32x32xf32>, vector<1x32xf32> -> vector<1x32xf32>
    %22 = arith.addf %20, %21 : vector<1x32xf32>
    %23 = math.tanh %22 : vector<1x32xf32>
    %24 = vector.extract_strided_slice %9 {offsets = [3, 0], sizes = [1, 32], strides = [1, 1]} : vector<16x32xf32> to vector<1x32xf32>
    %cst_17 = arith.constant dense<0.000000e+00> : vector<1x32xf32>
    %25 = tpu.matmul %23, %10, %cst_17 {dimension_numbers = #tpu.dot_dimension_numbers<[1], [0], [0], [1], [0, 0, 1, 1], [], []>} : vector<1x32xf32>, vector<32x32xf32>, vector<1x32xf32> -> vector<1x32xf32>
    %26 = arith.addf %24, %25 : vector<1x32xf32>
    %27 = math.tanh %26 : vector<1x32xf32>
    %28 = vector.extract_strided_slice %9 {offsets = [4, 0], sizes = [1, 32], strides = [1, 1]} : vector<16x32xf32> to vector<1x32xf32>
    %cst_18 = arith.constant dense<0.000000e+00> : vector<1x32xf32>
    %29 = tpu.matmul %27, %10, %cst_18 {dimension_numbers = #tpu.dot_dimension_numbers<[1], [0], [0], [1], [0, 0, 1, 1], [], []>} : vector<1x32xf32>, vector<32x32xf32>, vector<1x32xf32> -> vector<1x32xf32>
    %30 = arith.addf %28, %29 : vector<1x32xf32>
    %31 = math.tanh %30 : vector<1x32xf32>
    %32 = vector.extract_strided_slice %9 {offsets = [5, 0], sizes = [1, 32], strides = [1, 1]} : vector<16x32xf32> to vector<1x32xf32>
    %cst_19 = arith.constant dense<0.000000e+00> : vector<1x32xf32>
    %33 = tpu.matmul %31, %10, %cst_19 {dimension_numbers = #tpu.dot_dimension_numbers<[1], [0], [0], [1], [0, 0, 1, 1], [], []>} : vector<1x32xf32>, vector<32x32xf32>, vector<1x32xf32> -> vector<1x32xf32>
    %34 = arith.addf %32, %33 : vector<1x32xf32>
    %35 = math.tanh %34 : vector<1x32xf32>
    %36 = vector.extract_strided_slice %9 {offsets = [6, 0], sizes = [1, 32], strides = [1, 1]} : vector<16x32xf32> to vector<1x32xf32>
    %cst_20 = arith.constant dense<0.000000e+00> : vector<1x32xf32>
    %37 = tpu.matmul %35, %10, %cst_20 {dimension_numbers = #tpu.dot_dimension_numbers<[1], [0], [0], [1], [0, 0, 1, 1], [], []>} : vector<1x32xf32>, vector<32x32xf32>, vector<1x32xf32> -> vector<1x32xf32>
    %38 = arith.addf %36, %37 : vector<1x32xf32>
    %39 = math.tanh %38 : vector<1x32xf32>
    %40 = vector.extract_strided_slice %9 {offsets = [7, 0], sizes = [1, 32], strides = [1, 1]} : vector<16x32xf32> to vector<1x32xf32>
    %cst_21 = arith.constant dense<0.000000e+00> : vector<1x32xf32>
    %41 = tpu.matmul %39, %10, %cst_21 {dimension_numbers = #tpu.dot_dimension_numbers<[1], [0], [0], [1], [0, 0, 1, 1], [], []>} : vector<1x32xf32>, vector<32x32xf32>, vector<1x32xf32> -> vector<1x32xf32>
    %42 = arith.addf %40, %41 : vector<1x32xf32>
    %43 = math.tanh %42 : vector<1x32xf32>
    %44 = vector.extract_strided_slice %9 {offsets = [8, 0], sizes = [1, 32], strides = [1, 1]} : vector<16x32xf32> to vector<1x32xf32>
    %cst_22 = arith.constant dense<0.000000e+00> : vector<1x32xf32>
    %45 = tpu.matmul %43, %10, %cst_22 {dimension_numbers = #tpu.dot_dimension_numbers<[1], [0], [0], [1], [0, 0, 1, 1], [], []>} : vector<1x32xf32>, vector<32x32xf32>, vector<1x32xf32> -> vector<1x32xf32>
    %46 = arith.addf %44, %45 : vector<1x32xf32>
    %47 = math.tanh %46 : vector<1x32xf32>
    %48 = vector.extract_strided_slice %9 {offsets = [9, 0], sizes = [1, 32], strides = [1, 1]} : vector<16x32xf32> to vector<1x32xf32>
    %cst_23 = arith.constant dense<0.000000e+00> : vector<1x32xf32>
    %49 = tpu.matmul %47, %10, %cst_23 {dimension_numbers = #tpu.dot_dimension_numbers<[1], [0], [0], [1], [0, 0, 1, 1], [], []>} : vector<1x32xf32>, vector<32x32xf32>, vector<1x32xf32> -> vector<1x32xf32>
    %50 = arith.addf %48, %49 : vector<1x32xf32>
    %51 = math.tanh %50 : vector<1x32xf32>
    %52 = vector.extract_strided_slice %9 {offsets = [10, 0], sizes = [1, 32], strides = [1, 1]} : vector<16x32xf32> to vector<1x32xf32>
    %cst_24 = arith.constant dense<0.000000e+00> : vector<1x32xf32>
    %53 = tpu.matmul %51, %10, %cst_24 {dimension_numbers = #tpu.dot_dimension_numbers<[1], [0], [0], [1], [0, 0, 1, 1], [], []>} : vector<1x32xf32>, vector<32x32xf32>, vector<1x32xf32> -> vector<1x32xf32>
    %54 = arith.addf %52, %53 : vector<1x32xf32>
    %55 = math.tanh %54 : vector<1x32xf32>
    %56 = vector.extract_strided_slice %9 {offsets = [11, 0], sizes = [1, 32], strides = [1, 1]} : vector<16x32xf32> to vector<1x32xf32>
    %cst_25 = arith.constant dense<0.000000e+00> : vector<1x32xf32>
    %57 = tpu.matmul %55, %10, %cst_25 {dimension_numbers = #tpu.dot_dimension_numbers<[1], [0], [0], [1], [0, 0, 1, 1], [], []>} : vector<1x32xf32>, vector<32x32xf32>, vector<1x32xf32> -> vector<1x32xf32>
    %58 = arith.addf %56, %57 : vector<1x32xf32>
    %59 = math.tanh %58 : vector<1x32xf32>
    %60 = vector.extract_strided_slice %9 {offsets = [12, 0], sizes = [1, 32], strides = [1, 1]} : vector<16x32xf32> to vector<1x32xf32>
    %cst_26 = arith.constant dense<0.000000e+00> : vector<1x32xf32>
    %61 = tpu.matmul %59, %10, %cst_26 {dimension_numbers = #tpu.dot_dimension_numbers<[1], [0], [0], [1], [0, 0, 1, 1], [], []>} : vector<1x32xf32>, vector<32x32xf32>, vector<1x32xf32> -> vector<1x32xf32>
    %62 = arith.addf %60, %61 : vector<1x32xf32>
    %63 = math.tanh %62 : vector<1x32xf32>
    %64 = vector.extract_strided_slice %9 {offsets = [13, 0], sizes = [1, 32], strides = [1, 1]} : vector<16x32xf32> to vector<1x32xf32>
    %cst_27 = arith.constant dense<0.000000e+00> : vector<1x32xf32>
    %65 = tpu.matmul %63, %10, %cst_27 {dimension_numbers = #tpu.dot_dimension_numbers<[1], [0], [0], [1], [0, 0, 1, 1], [], []>} : vector<1x32xf32>, vector<32x32xf32>, vector<1x32xf32> -> vector<1x32xf32>
    %66 = arith.addf %64, %65 : vector<1x32xf32>
    %67 = math.tanh %66 : vector<1x32xf32>
    %68 = vector.extract_strided_slice %9 {offsets = [14, 0], sizes = [1, 32], strides = [1, 1]} : vector<16x32xf32> to vector<1x32xf32>
    %cst_28 = arith.constant dense<0.000000e+00> : vector<1x32xf32>
    %69 = tpu.matmul %67, %10, %cst_28 {dimension_numbers = #tpu.dot_dimension_numbers<[1], [0], [0], [1], [0, 0, 1, 1], [], []>} : vector<1x32xf32>, vector<32x32xf32>, vector<1x32xf32> -> vector<1x32xf32>
    %70 = arith.addf %68, %69 : vector<1x32xf32>
    %71 = math.tanh %70 : vector<1x32xf32>
    %72 = vector.extract_strided_slice %9 {offsets = [15, 0], sizes = [1, 32], strides = [1, 1]} : vector<16x32xf32> to vector<1x32xf32>
    %cst_29 = arith.constant dense<0.000000e+00> : vector<1x32xf32>
    %73 = tpu.matmul %71, %10, %cst_29 {dimension_numbers = #tpu.dot_dimension_numbers<[1], [0], [0], [1], [0, 0, 1, 1], [], []>} : vector<1x32xf32>, vector<32x32xf32>, vector<1x32xf32> -> vector<1x32xf32>
    %74 = arith.addf %72, %73 : vector<1x32xf32>
    %75 = math.tanh %74 : vector<1x32xf32>
    %76 = tpu.concatenate %15, %19, %23, %27, %31, %35, %39, %43, %47, %51, %55, %59, %63, %67, %71, %75 in 0 : vector<1x32xf32>, vector<1x32xf32>, vector<1x32xf32>, vector<1x32xf32>, vector<1x32xf32>, vector<1x32xf32>, vector<1x32xf32>, vector<1x32xf32>, vector<1x32xf32>, vector<1x32xf32>, vector<1x32xf32>, vector<1x32xf32>, vector<1x32xf32>, vector<1x32xf32>, vector<1x32xf32>, vector<1x32xf32> -> vector<16x32xf32>
    %c0_30 = arith.constant 0 : index
    %c0_31 = arith.constant 0 : index
    %77 = vector.load %arg8[%c0_30, %c0_31] : memref<32x32xf32, #tpu.memory_space<vmem>>, vector<32x32xf32>
    %cst_32 = arith.constant dense<0.000000e+00> : vector<8x32xf32>
    %78 = tpu.matmul %3, %77, %cst_32 {dimension_numbers = #tpu.dot_dimension_numbers<[1], [0], [0], [1], [0, 0, 1, 1], [], []>} : vector<8x32xf32>, vector<32x32xf32>, vector<8x32xf32> -> vector<8x32xf32>
    %c0_33 = arith.constant 0 : index
    %c0_34 = arith.constant 0 : index
    %79 = vector.load %arg10[%c0_33, %c0_34] : memref<1x32xf32, #tpu.memory_space<vmem>>, vector<1x32xf32>
    %80 = vector.broadcast %79 : vector<1x32xf32> to vector<8x32xf32>
    %81 = arith.addf %78, %80 : vector<8x32xf32>
    %c0_35 = arith.constant 0 : index
    %c0_36 = arith.constant 0 : index
    %82 = vector.load %arg9[%c0_35, %c0_36] : memref<32x32xf32, #tpu.memory_space<vmem>>, vector<32x32xf32>
    %83 = vector.extract_strided_slice %81 {offsets = [0, 0], sizes = [1, 32], strides = [1, 1]} : vector<8x32xf32> to vector<1x32xf32>
    %cst_37 = arith.constant dense<0.000000e+00> : vector<1x32xf32>
    %84 = tpu.matmul %75, %82, %cst_37 {dimension_numbers = #tpu.dot_dimension_numbers<[1], [0], [0], [1], [0, 0, 1, 1], [], []>} : vector<1x32xf32>, vector<32x32xf32>, vector<1x32xf32> -> vector<1x32xf32>
    %85 = arith.addf %83, %84 : vector<1x32xf32>
    %86 = math.tanh %85 : vector<1x32xf32>
    %87 = vector.extract_strided_slice %81 {offsets = [1, 0], sizes = [1, 32], strides = [1, 1]} : vector<8x32xf32> to vector<1x32xf32>
    %cst_38 = arith.constant dense<0.000000e+00> : vector<1x32xf32>
    %88 = tpu.matmul %86, %82, %cst_38 {dimension_numbers = #tpu.dot_dimension_numbers<[1], [0], [0], [1], [0, 0, 1, 1], [], []>} : vector<1x32xf32>, vector<32x32xf32>, vector<1x32xf32> -> vector<1x32xf32>
    %89 = arith.addf %87, %88 : vector<1x32xf32>
    %90 = math.tanh %89 : vector<1x32xf32>
    %91 = vector.extract_strided_slice %81 {offsets = [2, 0], sizes = [1, 32], strides = [1, 1]} : vector<8x32xf32> to vector<1x32xf32>
    %cst_39 = arith.constant dense<0.000000e+00> : vector<1x32xf32>
    %92 = tpu.matmul %90, %82, %cst_39 {dimension_numbers = #tpu.dot_dimension_numbers<[1], [0], [0], [1], [0, 0, 1, 1], [], []>} : vector<1x32xf32>, vector<32x32xf32>, vector<1x32xf32> -> vector<1x32xf32>
    %93 = arith.addf %91, %92 : vector<1x32xf32>
    %94 = math.tanh %93 : vector<1x32xf32>
    %95 = vector.extract_strided_slice %81 {offsets = [3, 0], sizes = [1, 32], strides = [1, 1]} : vector<8x32xf32> to vector<1x32xf32>
    %cst_40 = arith.constant dense<0.000000e+00> : vector<1x32xf32>
    %96 = tpu.matmul %94, %82, %cst_40 {dimension_numbers = #tpu.dot_dimension_numbers<[1], [0], [0], [1], [0, 0, 1, 1], [], []>} : vector<1x32xf32>, vector<32x32xf32>, vector<1x32xf32> -> vector<1x32xf32>
    %97 = arith.addf %95, %96 : vector<1x32xf32>
    %98 = math.tanh %97 : vector<1x32xf32>
    %99 = vector.extract_strided_slice %81 {offsets = [4, 0], sizes = [1, 32], strides = [1, 1]} : vector<8x32xf32> to vector<1x32xf32>
    %cst_41 = arith.constant dense<0.000000e+00> : vector<1x32xf32>
    %100 = tpu.matmul %98, %82, %cst_41 {dimension_numbers = #tpu.dot_dimension_numbers<[1], [0], [0], [1], [0, 0, 1, 1], [], []>} : vector<1x32xf32>, vector<32x32xf32>, vector<1x32xf32> -> vector<1x32xf32>
    %101 = arith.addf %99, %100 : vector<1x32xf32>
    %102 = math.tanh %101 : vector<1x32xf32>
    %103 = vector.extract_strided_slice %81 {offsets = [5, 0], sizes = [1, 32], strides = [1, 1]} : vector<8x32xf32> to vector<1x32xf32>
    %cst_42 = arith.constant dense<0.000000e+00> : vector<1x32xf32>
    %104 = tpu.matmul %102, %82, %cst_42 {dimension_numbers = #tpu.dot_dimension_numbers<[1], [0], [0], [1], [0, 0, 1, 1], [], []>} : vector<1x32xf32>, vector<32x32xf32>, vector<1x32xf32> -> vector<1x32xf32>
    %105 = arith.addf %103, %104 : vector<1x32xf32>
    %106 = math.tanh %105 : vector<1x32xf32>
    %107 = vector.extract_strided_slice %81 {offsets = [6, 0], sizes = [1, 32], strides = [1, 1]} : vector<8x32xf32> to vector<1x32xf32>
    %cst_43 = arith.constant dense<0.000000e+00> : vector<1x32xf32>
    %108 = tpu.matmul %106, %82, %cst_43 {dimension_numbers = #tpu.dot_dimension_numbers<[1], [0], [0], [1], [0, 0, 1, 1], [], []>} : vector<1x32xf32>, vector<32x32xf32>, vector<1x32xf32> -> vector<1x32xf32>
    %109 = arith.addf %107, %108 : vector<1x32xf32>
    %110 = math.tanh %109 : vector<1x32xf32>
    %111 = vector.extract_strided_slice %81 {offsets = [7, 0], sizes = [1, 32], strides = [1, 1]} : vector<8x32xf32> to vector<1x32xf32>
    %cst_44 = arith.constant dense<0.000000e+00> : vector<1x32xf32>
    %112 = tpu.matmul %110, %82, %cst_44 {dimension_numbers = #tpu.dot_dimension_numbers<[1], [0], [0], [1], [0, 0, 1, 1], [], []>} : vector<1x32xf32>, vector<32x32xf32>, vector<1x32xf32> -> vector<1x32xf32>
    %113 = arith.addf %111, %112 : vector<1x32xf32>
    %114 = math.tanh %113 : vector<1x32xf32>
    %115 = tpu.concatenate %86, %90, %94, %98, %102, %106, %110, %114 in 0 : vector<1x32xf32>, vector<1x32xf32>, vector<1x32xf32>, vector<1x32xf32>, vector<1x32xf32>, vector<1x32xf32>, vector<1x32xf32>, vector<1x32xf32> -> vector<8x32xf32>
    %c0_45 = arith.constant 0 : index
    %c0_46 = arith.constant 0 : index
    %c0_47 = arith.constant 0 : index
    %116 = vector.load %arg16[%c0_45, %c0_46, %c0_47] : memref<1x1x32xf32, #tpu.memory_space<vmem>>, vector<1x1x32xf32>
    %117 = vector.shape_cast %116 : vector<1x1x32xf32> to vector<1x32xf32>
    %118 = vector.shape_cast %114 : vector<1x32xf32> to vector<1x1x32xf32>
    tpu.vector_store %arg16[%c0_45, %c0_46, %c0_47], %118 {strides = array<i32>} : memref<1x1x32xf32, #tpu.memory_space<vmem>>, vector<1x1x32xf32>,
    %119 = tpu.concatenate %76, %4 in 0 : vector<16x32xf32>, vector<4x32xf32> -> vector<20x32xf32>
    %cst_48 = arith.constant dense<0.000000e+00> : vector<8x20xf32>
    %120 = tpu.matmul %115, %119, %cst_48 {dimension_numbers = #tpu.dot_dimension_numbers<[1], [1], [0], [0], [0, 0, 1, 0], [], []>} : vector<8x32xf32>, vector<20x32xf32>, vector<8x20xf32> -> vector<8x20xf32>
    %121 = vector.extract_strided_slice %120 {offsets = [0, 0], sizes = [8, 16], strides = [1, 1]} : vector<8x20xf32> to vector<8x16xf32>
    %122 = vector.extract_strided_slice %120 {offsets = [0, 16], sizes = [8, 4], strides = [1, 1]} : vector<8x20xf32> to vector<8x4xf32>
    %123 = tpu.iota {dimensions = array<i32: 1>} : vector<8x16xi32>
    %124 = arith.index_cast %arg0 : i32 to index
    %125 = memref.load %arg1[%124] : memref<2xi32, #tpu.memory_space<smem>>
    %126 = vector.broadcast %125 : i32 to vector<8x16xi32>
    %127 = arith.cmpi slt, %123, %126 : vector<8x16xi32>
    %cst_49 = arith.constant -1.000000e+30 : f32
    %128 = vector.broadcast %cst_49 : f32 to vector<8x16xf32>
    %129 = arith.select %127, %121, %128 : vector<8x16xi1>, vector<8x16xf32>
    %cst_50 = arith.constant dense<0xFF800000> : vector<8xf32>
    %130 = vector.multi_reduction <maximumf>, %129, %cst_50 [1] : vector<8x16xf32> to vector<8xf32>
    %131 = vector.shape_cast %130 : vector<8xf32> to vector<8x1xf32>
    %132 = vector.broadcast %131 : vector<8x1xf32> to vector<8x16xf32>
    %133 = arith.subf %129, %132 : vector<8x16xf32>
    %134 = math.exp %133 : vector<8x16xf32>
    %cst_51 = arith.constant dense<0.000000e+00> : vector<8xf32>
    %135 = vector.multi_reduction <add>, %134, %cst_51 [1] : vector<8x16xf32> to vector<8xf32>
    %136 = vector.shape_cast %135 : vector<8xf32> to vector<8x1xf32>
    %137 = vector.broadcast %136 : vector<8x1xf32> to vector<8x16xf32>
    %138 = arith.divf %134, %137 : vector<8x16xf32>
    %cst_52 = arith.constant dense<0xFF800000> : vector<8xf32>
    %139 = vector.multi_reduction <maximumf>, %122, %cst_52 [1] : vector<8x4xf32> to vector<8xf32>
    %140 = vector.shape_cast %139 : vector<8xf32> to vector<8x1xf32>
    %141 = vector.broadcast %140 : vector<8x1xf32> to vector<8x4xf32>
    %142 = arith.subf %122, %141 : vector<8x4xf32>
    %143 = math.exp %142 : vector<8x4xf32>
    %cst_53 = arith.constant dense<0.000000e+00> : vector<8xf32>
    %144 = vector.multi_reduction <add>, %143, %cst_53 [1] : vector<8x4xf32> to vector<8xf32>
    %145 = vector.shape_cast %144 : vector<8xf32> to vector<8x1xf32>
    %146 = vector.broadcast %145 : vector<8x1xf32> to vector<8x4xf32>
    %147 = arith.divf %143, %146 : vector<8x4xf32>
    %cst_54 = arith.constant dense<0.000000e+00> : vector<8x32xf32>
    %148 = tpu.matmul %138, %76, %cst_54 {dimension_numbers = #tpu.dot_dimension_numbers<[1], [0], [0], [1], [0, 0, 1, 1], [], []>} : vector<8x16xf32>, vector<16x32xf32>, vector<8x32xf32> -> vector<8x32xf32>
    %cst_55 = arith.constant dense<0.000000e+00> : vector<8x32xf32>
    %149 = tpu.matmul %147, %4, %cst_55 {dimension_numbers = #tpu.dot_dimension_numbers<[1], [0], [0], [1], [0, 0, 1, 1], [], []>} : vector<8x4xf32>, vector<4x32xf32>, vector<8x32xf32> -> vector<8x32xf32>
    %150 = tpu.concatenate %148, %115, %149 in 1 : vector<8x32xf32>, vector<8x32xf32>, vector<8x32xf32> -> vector<8x96xf32>
    %c0_56 = arith.constant 0 : index
    %c0_57 = arith.constant 0 : index
    %151 = vector.load %arg11[%c0_56, %c0_57] : memref<96x64xf32, #tpu.memory_space<vmem>>, vector<96x64xf32>
    %cst_58 = arith.constant dense<0.000000e+00> : vector<8x64xf32>
    %152 = tpu.matmul %150, %151, %cst_58 {dimension_numbers = #tpu.dot_dimension_numbers<[1], [0], [0], [1], [0, 0, 1, 1], [], []>} : vector<8x96xf32>, vector<96x64xf32>, vector<8x64xf32> -> vector<8x64xf32>
    %c0_59 = arith.constant 0 : index
    %c0_60 = arith.constant 0 : index
    %153 = vector.load %arg12[%c0_59, %c0_60] : memref<1x64xf32, #tpu.memory_space<vmem>>, vector<1x64xf32>
    %154 = vector.broadcast %153 : vector<1x64xf32> to vector<8x64xf32>
    %155 = arith.addf %152, %154 : vector<8x64xf32>
    %156 = math.tanh %155 : vector<8x64xf32>
    %157 = vector.extract_strided_slice %156 {offsets = [0, 0], sizes = [8, 32], strides = [1, 1]} : vector<8x64xf32> to vector<8x32xf32>
    %158 = vector.extract_strided_slice %156 {offsets = [0, 32], sizes = [8, 32], strides = [1, 1]} : vector<8x64xf32> to vector<8x32xf32>
    %159 = arith.addf %157, %158 : vector<8x32xf32>
    %c0_61 = arith.constant 0 : index
    %c0_62 = arith.constant 0 : index
    %c0_63 = arith.constant 0 : index
    %160 = vector.load %arg13[%c0_61, %c0_62, %c0_63] : memref<1x8x32xf32, #tpu.memory_space<vmem>>, vector<1x8x32xf32>
    %161 = vector.shape_cast %160 : vector<1x8x32xf32> to vector<8x32xf32>
    %162 = vector.shape_cast %159 : vector<8x32xf32> to vector<1x8x32xf32>
    tpu.vector_store %arg13[%c0_61, %c0_62, %c0_63], %162 {strides = array<i32>} : memref<1x8x32xf32, #tpu.memory_space<vmem>>, vector<1x8x32xf32>,
    %c0_64 = arith.constant 0 : index
    %c0_65 = arith.constant 0 : index
    %c0_66 = arith.constant 0 : index
    %163 = vector.load %arg14[%c0_64, %c0_65, %c0_66] : memref<1x8x16xf32, #tpu.memory_space<vmem>>, vector<1x8x16xf32>
    %164 = vector.shape_cast %163 : vector<1x8x16xf32> to vector<8x16xf32>
    %165 = vector.shape_cast %138 : vector<8x16xf32> to vector<1x8x16xf32>
    tpu.vector_store %arg14[%c0_64, %c0_65, %c0_66], %165 {strides = array<i32>} : memref<1x8x16xf32, #tpu.memory_space<vmem>>, vector<1x8x16xf32>,
    %c0_67 = arith.constant 0 : index
    %c0_68 = arith.constant 0 : index
    %c0_69 = arith.constant 0 : index
    %166 = vector.load %arg15[%c0_67, %c0_68, %c0_69] : memref<1x8x4xf32, #tpu.memory_space<vmem>>, vector<1x8x4xf32>
    %167 = vector.shape_cast %166 : vector<1x8x4xf32> to vector<8x4xf32>
    %168 = vector.shape_cast %147 : vector<8x4xf32> to vector<1x8x4xf32>
    tpu.vector_store %arg15[%c0_67, %c0_68, %c0_69], %168 {strides = array<i32>} : memref<1x8x4xf32, #tpu.memory_space<vmem>>, vector<1x8x4xf32>,
    return
  }
  func.func @transform_0(%arg0: i32, %arg1: memref<2xi32, #tpu.memory_space<smem>>) -> (i32, i32, i32) {
    %c0_i32 = arith.constant 0 : i32
    %c0_i32_0 = arith.constant 0 : i32
    %c0_i32_1 = arith.constant 0 : i32
    return %arg0, %c0_i32, %c0_i32_0 : i32, i32, i32
  }
  func.func @transform_1(%arg0: i32, %arg1: memref<2xi32, #tpu.memory_space<smem>>) -> (i32, i32, i32) {
    %c0_i32 = arith.constant 0 : i32
    %c0_i32_0 = arith.constant 0 : i32
    %c0_i32_1 = arith.constant 0 : i32
    return %arg0, %c0_i32, %c0_i32_0 : i32, i32, i32
  }
  func.func @transform_2(%arg0: i32, %arg1: memref<2xi32, #tpu.memory_space<smem>>) -> (i32, i32) {
    %c0_i32 = arith.constant 0 : i32
    %c0_i32_0 = arith.constant 0 : i32
    %c0_i32_1 = arith.constant 0 : i32
    return %c0_i32, %c0_i32_0 : i32, i32
  }
  func.func @transform_3(%arg0: i32, %arg1: memref<2xi32, #tpu.memory_space<smem>>) -> (i32, i32) {
    %c0_i32 = arith.constant 0 : i32
    %c0_i32_0 = arith.constant 0 : i32
    %c0_i32_1 = arith.constant 0 : i32
    return %c0_i32, %c0_i32_0 : i32, i32
  }
  func.func @transform_4(%arg0: i32, %arg1: memref<2xi32, #tpu.memory_space<smem>>) -> (i32, i32) {
    %c0_i32 = arith.constant 0 : i32
    %c0_i32_0 = arith.constant 0 : i32
    %c0_i32_1 = arith.constant 0 : i32
    return %c0_i32, %c0_i32_0 : i32, i32
  }
  func.func @transform_5(%arg0: i32, %arg1: memref<2xi32, #tpu.memory_space<smem>>) -> (i32, i32) {
    %c0_i32 = arith.constant 0 : i32
    %c0_i32_0 = arith.constant 0 : i32
    %c0_i32_1 = arith.constant 0 : i32
    return %c0_i32, %c0_i32_0 : i32, i32
  }
  func.func @transform_6(%arg0: i32, %arg1: memref<2xi32, #tpu.memory_space<smem>>) -> (i32, i32) {
    %c0_i32 = arith.constant 0 : i32
    %c0_i32_0 = arith.constant 0 : i32
    %c0_i32_1 = arith.constant 0 : i32
    return %c0_i32, %c0_i32_0 : i32, i32
  }
  func.func @transform_7(%arg0: i32, %arg1: memref<2xi32, #tpu.memory_space<smem>>) -> (i32, i32) {
    %c0_i32 = arith.constant 0 : i32
    %c0_i32_0 = arith.constant 0 : i32
    %c0_i32_1 = arith.constant 0 : i32
    return %c0_i32, %c0_i32_0 : i32, i32
  }
  func.func @transform_8(%arg0: i32, %arg1: memref<2xi32, #tpu.memory_space<smem>>) -> (i32, i32) {
    %c0_i32 = arith.constant 0 : i32
    %c0_i32_0 = arith.constant 0 : i32
    %c0_i32_1 = arith.constant 0 : i32
    return %c0_i32, %c0_i32_0 : i32, i32
  }
  func.func @transform_9(%arg0: i32, %arg1: memref<2xi32, #tpu.memory_space<smem>>) -> (i32, i32) {
    %c0_i32 = arith.constant 0 : i32
    %c0_i32_0 = arith.constant 0 : i32
    %c0_i32_1 = arith.constant 0 : i32
    return %c0_i32, %c0_i32_0 : i32, i32
  }
  func.func @transform_10(%arg0: i32, %arg1: memref<2xi32, #tpu.memory_space<smem>>) -> (i32, i32) {
    %c0_i32 = arith.constant 0 : i32
    %c0_i32_0 = arith.constant 0 : i32
    %c0_i32_1 = arith.constant 0 : i32
    return %c0_i32, %c0_i32_0 : i32, i32
  }
  func.func @transform_11(%arg0: i32, %arg1: memref<2xi32, #tpu.memory_space<smem>>) -> (i32, i32, i32) {
    %c0_i32 = arith.constant 0 : i32
    %c0_i32_0 = arith.constant 0 : i32
    %c0_i32_1 = arith.constant 0 : i32
    return %arg0, %c0_i32, %c0_i32_0 : i32, i32, i32
  }
  func.func @transform_12(%arg0: i32, %arg1: memref<2xi32, #tpu.memory_space<smem>>) -> (i32, i32, i32) {
    %c0_i32 = arith.constant 0 : i32
    %c0_i32_0 = arith.constant 0 : i32
    %c0_i32_1 = arith.constant 0 : i32
    return %arg0, %c0_i32, %c0_i32_0 : i32, i32, i32
  }
  func.func @transform_13(%arg0: i32, %arg1: memref<2xi32, #tpu.memory_space<smem>>) -> (i32, i32, i32) {
    %c0_i32 = arith.constant 0 : i32
    %c0_i32_0 = arith.constant 0 : i32
    %c0_i32_1 = arith.constant 0 : i32
    return %arg0, %c0_i32, %c0_i32_0 : i32, i32, i32
  }
  func.func @transform_14(%arg0: i32, %arg1: memref<2xi32, #tpu.memory_space<smem>>) -> (i32, i32, i32) {
    %c0_i32 = arith.constant 0 : i32
    %c0_i32_0 = arith.constant 0 : i32
    %c0_i32_1 = arith.constant 0 : i32
    return %arg0, %c0_i32, %c0_i32_0 : i32, i32, i32
  }
}

</mosaic_0001>

<bundles_post_ra>
// kernel: wals_doubly_attention_forward.1
= control target key start
LH: loop header
LB: loop body
LE: loop exit
PB: predicated region body
PF: predicated region fallthrough
CT: control target
= control target key end

     0   :  { %s4665_s0 = inlined_call_operand.vmem [shape: s32[2], index: 0, kind: input, shape index: {}]   ;;  %s4666_s1 = inlined_call_operand.vmem [shape: f32[2,16,32], index: 1, kind: input, shape index: {}]   ;;  %s4667_s2 = inlined_call_operand.vmem [shape: f32[2,8,32], index: 2, kind: input, shape index: {}]   ;;  %s4668_s3 = inlined_call_operand.vmem [shape: f32[4,32], index: 3, kind: input, shape index: {}]   ;;  %s4669_s4 = inlined_call_operand.vmem [shape: f32[32,32], index: 4, kind: input, shape index: {}]   ;;  %s4670_s5 = inlined_call_operand.vmem [shape: f32[32,32], index: 5, kind: input, shape index: {}]   ;;  %s4671_s6 = inlined_call_operand.vmem [shape: f32[1,32], index: 6, kind: input, shape index: {}]   ;;  %s4672_s7 = inlined_call_operand.vmem [shape: f32[32,32], index: 7, kind: input, shape index: {}]   ;;  %s4673_s8 = inlined_call_operand.vmem [shape: f32[32,32], index: 8, kind: input, shape index: {}]   ;;  %s4674_s9 = inlined_call_operand.vmem [shape: f32[1,32], index: 9, kind: input, shape index: {}]   ;;  %s4675_s10 = inlined_call_operand.vmem [shape: f32[96,64], index: 10, kind: input, shape index: {}]   ;;  %s4676_s11 = inlined_call_operand.vmem [shape: f32[1,64], index: 11, kind: input, shape index: {}]   ;;  %s4677_s12 = inlined_call_operand.vmem [shape: f32[2,8,32], index: 12, kind: output, shape index: {0}]   ;;  %s4678_s13 = inlined_call_operand.vmem [shape: f32[2,8,16], index: 13, kind: output, shape index: {1}]   ;;  %s4679_s14 = inlined_call_operand.vmem [shape: f32[2,8,4], index: 14, kind: output, shape index: {2}]   ;;  %s4680_s15 = inlined_call_operand.hbm [shape: f32[2,1,32], index: 15, kind: output, shape index: {3}]  }
   0x1   :  { %4684 = sst [smem:[#allocation11_spill]] %s4666_s1  ;;  %s21_s20 = sshll.u32 %s4665_s0, 4  ;;  %s22_s20 = int_to_ptr.vmem [resolvable:$true] %s21_s20 }
   0x2   :  { %4685 = sst [smem:[#allocation12_spill]] %s4667_s2  ;;  %s4001_s21 = scalar_lea.vmem %s22_s20, 16 }
   0x3   :  { %4686 = sst [smem:[#allocation13_spill]] %s4669_s4  ;;  %p4002_p0 = scmp.ne.s32.totalorder %s22_s20, %s4001_s21 }
   0x4   :  { %p4006_p1 = scmp.lt.s32.totalorder %s22_s20, %s22_s20  ;;  %p4007_p2 = scmp.lt.s32.totalorder %s4001_s21, %s4001_s21 }
   0x6   :  { %p4008_p3 = por %p4007_p2, %p4006_p1 }
   0x8   :  { %p4009_p4 = pnand %p4008_p3, %p4002_p0 }
   0xa   :  { %4012 = shalt.err (!%p4009_p4)  }
   0xb   :  { %s4079_s22 = smov [#allocation3]  }
   0xc   :  { %24 = dma.vmem_to_smem %s22_s20, 16, %s4079_s22, [#allocation2] }
   0xd   :  { %4057 = dma.done.wait [#allocation2], 16 }
   0xe   :  { %4058 = vsyncadd [#allocation2], 4294967280 }
   0xf   :  { %26 = sfence }
  0x10   :  { %27 = vsyncpa [#allocation5], 0 }
  0x11   :  { %29 = vsyncpa [#allocation5 + $0x1], 0  ;;  %s4171_s23 = smov 0   ;;  %s4173_s24 = smov 0  }
  0x12   :  { %s4175_s0 = smov 0   ;;  %s4177_s25 = smov 0  }
  0x13 LB: > { %4687 = sst [smem:[#allocation8_spill]] %s4073_s0  ;;  %s4192_s26 = sadd.s32 4294967295, %s4077_s25   ;;  %s4077_s25 = sphi %s4177_s25, %s4695_s25   ;;  %s4073_s0 = sphi %s4175_s0, %s4697_s0   ;;  %s4069_s24 = sphi %s4173_s24, %s4699_s24   ;;  %s4065_s23 = sphi %s4171_s23, %s4698_s23  }
  0x14   : > { %s3175_s27 = sadd.s32 4294967294, %s4077_s25   ;;  %s4196_s28 = sadd.s32 1, %s4077_s25  }
  0x15   : > { %4688 = sst [smem:[#allocation9_spill]] %s4196_s28  ;;  %s361_s29 = sadd.s32 1, %s4073_s0 }
  0x16   : > { %s358_s30 = ssub.s32 %s4077_s25, %s4196_s28  ;;  %p371_p5 = scmp.ne.s32.totalorder %s4073_s0, %s4069_s24 }
  0x17   : > { %p359_p6 = scmp.eq.s32.totalorder %s358_s30, 0  ;;  %p372_p7 = scmp.eq.s32.totalorder %s4192_s26, 1 }
  0x18   : > { %p377_p8 = scmp.ne.s32.totalorder %s4069_s24, %s4065_s23  ;;  %p378_p9 = scmp.eq.s32.totalorder %s3175_s27, 1 }
  0x19   : > { %s4207_s16 = scalar_select %p359_p6, %s4073_s0, %s361_s29  }
  0x1a   : > { %p4209_p10 = por %p372_p7, %p371_p5  ;;  %p4213_p11 = por %p378_p9, %p377_p8 }
  0x1b   : > { %4689 = sst [smem:[#allocation10_spill]] %s4207_s16  ;;  %p3178_p12 = scmp.ge.s32.totalorder %s4077_s25, 1 }
  0x1c   : > { %p438_p13 = scmp.lt.s32.totalorder %s4077_s25, 3 }
  0x1e   : > { %p439_p0 = pnand %p3178_p12, %p438_p13 }
  0x1f   : > { %s4692_s4 = sld [smem:[#allocation13_spill]] (!%p439_p0)  ;;  %p499_p1 = scmp.lt.s32.totalorder (!%p439_p0), %s4192_s26, 1  ;;  %v617_v5 = vld [vmem:[%s4670_s5] sm:$0xff] (!%p439_p0)  ;;  %v618_v6 = vld [vmem:[%s4670_s5 + $0x8] sm:$0xff] (!%p439_p0)  ;;  %v4080_v7 = vmov (!%p439_p0), 0.0|0.0   ;;  %vm4081_vm0 = vmmov (!%p439_p0), 0  }
  0x20   : > { %442 = sbr.rel (%p439_p0) target bundleno = 6970 (0x1b3a), region = 64  ;;  %3733 = vmatprep.subr.bf16.mxu1 (!%p439_p0), %v4080_v7  ;;  %v4242_v9 = vpack.c.bf16 (!%p439_p0), %v618_v6, %v617_v5  ;;  %v4082_v10 = vmov (!%p439_p0), 0.0   ;;  %v619_v11 = vld [vmem:[%s4670_s5 + $0x10] sm:$0xff] (!%p439_p0)  ;;  %v620_v12 = vld [vmem:[%s4670_s5 + $0x18] sm:$0xff] (!%p439_p0)  ;;  %vm535_vm1 = vcmask (!%p439_p0), 261120   ;;  %s4693_s1 = sld [smem:[#allocation11_spill]] (!%p439_p0) }
  0x21   : > { %3420 = vmatprep.mubr.msk.f32.mxu1 (!%p439_p0), %vm4081_vm0, %v4082_v10  ;;  %v4258_v14 = vpack.c.bf16 (!%p439_p0), %v620_v12, %v619_v11  ;;  %v3185_v16 = vld [vmem:[%s4671_s6] ss:$0 sm:$0xff] (!%p439_p0)  ;;  %vm1876_vm2 = vcmask (!%p439_p0), 1040384   ;;  %vm1878_vm3 = vcmask (!%p439_p0), 1041408   ;;  %vm1880_vm4 = vcmask (!%p439_p0), 1042432   ;;  %s4694_s2 = sld [smem:[#allocation12_spill]] (!%p439_p0)  ;;  %vm3873_vm9 = vmpackc.low (!%p439_p0), %vm535_vm1, %vm535_vm1 }
  0x22   : > { %3735 = vmatpush3.bf16.msra.mxu1 (!%p439_p0), %v4242_v9  ;;  %vm1882_vm5 = vcmask (!%p439_p0), 1043456   ;;  %vm1884_vm6 = vcmask (!%p439_p0), 1044480   ;;  %vm1886_vm7 = vcmask (!%p439_p0), 1045504   ;;  %vm1888_vm8 = vcmask (!%p439_p0), 1046528   ;;  %s497_s22 = sand.u32 (!%p439_p0), 1, %s4069_s24   ;;  %s4083_s29 = smov (!%p439_p0), 112  }
  0x23   : > { %3736 = vmatprep.subr.bf16.mxu1 (!%p439_p0), %v4080_v7  ;;  %vm2620_vm10 = vcmask (!%p439_p0), 261127   ;;  %vm2722_vm11 = vcmask (!%p439_p0), 162944   ;;  %vm2710_vm13 = vcmask (!%p439_p0), 130048   ;;  %vm2733_vm14 = vcmask (!%p439_p0), 31744   ;;  %s4085_s0 = smov (!%p439_p0), 64   ;;  %s4086_s28 = smov (!%p439_p0), [#allocation4]  }
  0x24   : > { %vm2897_vm15 = vcmask (!%p439_p0), 523264  }
  0x25   : > { %v524_v0 = vld [vmem:[%s4692_s4] sm:$0xff] (!%p439_p0)  ;;  %v525_v1 = vld [vmem:[%s4692_s4 + $0x8] sm:$0xff] (!%p439_p0)  ;;  %v526_v2 = vld [vmem:[%s4692_s4 + $0x10] sm:$0xff] (!%p439_p0) }
  0x26   : > { %v3713_v3 = vpack.c.bf16 (!%p439_p0), %v525_v1, %v524_v0  ;;  %v527_v4 = vld [vmem:[%s4692_s4 + $0x18] sm:$0xff] (!%p439_p0)  ;;  %3738 = vmatpush3.bf16.msra.mxu1 (!%p439_p0), %v4258_v14 }
  0x27   : > { %v3717_v8 = vpack.c.bf16 %v527_v4, %v526_v2  ;;  %s4240_s21 = scalar_select %p499_p1, %s4192_s26, 1  ;;  %3745 = vmatprep.subr.bf16.mxu1 %v4080_v7 }
  0x28   : > { %3714 = vmatprep.subr.bf16.mxu0 %v3713_v3 }
  0x29   : > { %3716 = vmatpush3.bf16.msra.mxu0 %v3713_v3  ;;  %s3225_s27 = sshll.u32 %s4240_s21, 4 }
  0x2a   : > { %3718 = vmatprep.subr.bf16.mxu0 %v3717_v8  ;;  %s503_s19 = scalar_lea.vmem %s4693_s1, %s3225_s27  ;;  %s4546_s27 = scalar_lea.vmem [#allocation4], %s497_s22 }
  0x2b   : > { %v520_v13 = vld [vmem:[%s503_s19] sm:$0xff]  ;;  %v521_v15 = vld [vmem:[%s503_s19 + $0x8] sm:$0xff]  ;;  %s4422_s19 = sshll.u32 %s4240_s21, 3  ;;  %s2706_s21 = sld [smem:[#allocation3 + %s4192_s26]] }
  0x2c   : > { %3387 = vmatprep.mubr.msk.f32.mxu0 %vm535_vm1, %v520_v13  ;;  %s507_s30 = scalar_lea.vmem %s4694_s2, %s4422_s19  ;;  %s4084_s1 = smov 32  }
  0x2d   : > { %3720 = vmatpush3.bf16.msra.mxu0 %v3717_v8  ;;  %s515_s20 = scalar_lea.vmem %s4678_s13, %s4422_s19  ;;  %s519_s16 = scalar_lea.vmem %s4679_s14, %s4422_s19 }
  0x2e   : > { %3721 = vmatprep.subr.bf16.mxu0 %v4080_v7 }
  0x30   : > { %3388 = vmatmul.mubr.msk.f32.vlgmr.msra.gmra.mrb[0].mxu0 %vm535_vm1, %v521_v15 }
  0x31   : > { %3723 = vmatpush3.bf16.msra.mxu0 %v4242_v9  ;;  %3398 = vmatprep.mubr.msk.f32.mxu0 %vm4081_vm0, %v4082_v10 }
  0x32   : > { %3724 = vmatprep.subr.bf16.mxu0 %v4080_v7 }
  0x35   : > { %3726 = vmatpush3.bf16.msra.mxu0 %v4258_v14 }
  0x36   : > { %3727 = vmatprep.subr.bf16.mxu0 %v4080_v7 }
  0x38   : > { %3399 = vmatmul.mubr.f32.vlgmr.msra.gmra.mrb[2].mxu0 %v4082_v10 }
  0x39   : > { %3729 = vmatpush3.bf16.msra.mxu0 %v4242_v9  ;;  %3409 = vmatprep.mubr.msk.f32.mxu0 %vm4081_vm0, %v4082_v10 }
  0x3a   : > { %3730 = vmatprep.subr.bf16.mxu0 %v4080_v7 }
  0x3d   : > { %3732 = vmatpush3.bf16.msra.mxu0 %v4258_v14 }
  0x3e   : > { %3739 = vmatprep.subr.bf16.mxu0 %v4080_v7 }
 0x103   : > { %v3389_v17 = vpop.f32.mrb[0].mxu0 }
 0x104   : > { %v4281_v18 = vadd.f32 %v3389_v17, %v3185_v16  ;;  %v608_v19 = vpop.f32.mrb[1].mxu0 }
 0x105   : > { %v4283_v20 = vadd.f32 %v3185_v16, %v608_v19 }
 0x10b   : > { %v690_v21 = vpop.f32.mrb[2].mxu0 }
 0x10c   : > { %v694_v22 = vadd.f32 %v690_v21, %v4283_v20  ;;  %v3400_v23 = vpop.f32.mrb[3].mxu0 }
 0x10e   : > { %3943 = vtanh.f32 %v694_v22 }
 0x118   : > { %v3944_v24 = vpop.eup %3943 }
 0x119   : > { %3410 = vmatmul.mubr.msk.f32.vlgmr.msra.gmra.mrb[4].mxu0 %vm535_vm1, %v3944_v24 }
 0x11a   : > { %3741 = vmatpush3.bf16.msra.mxu0 %v4242_v9  ;;  %3431 = vmatprep.mubr.msk.f32.mxu0 %vm4081_vm0, %v4082_v10 }
 0x11b   : > { %3742 = vmatprep.subr.bf16.mxu0 %v4080_v7 }
 0x11e   : > { %3744 = vmatpush3.bf16.msra.mxu0 %v4258_v14 }
 0x11f   : > { %3751 = vmatprep.subr.bf16.mxu0 %v4080_v7 }
 0x1ec   : > { %v765_v25 = vpop.f32.mrb[4].mxu0 }
 0x1ed   : > { %v770_v26 = vrot.slane %v765_v25, 7  ;;  %v3411_v27 = vpop.f32.mrb[5].mxu0 }
 0x1ef   : > { %v772_v28 = vadd.f32 %v770_v26, %v4283_v20 }
 0x1f1   : > { %3945 = vtanh.f32 %v772_v28 }
 0x1fb   : > { %v3946_v29 = vpop.eup %3945 }
 0x1fc   : > { %v775_v30 = vrot.slane %v3946_v29, 1  ;;  %v1877_v36 = vsel %vm1876_vm2, %v3944_v24, %v3946_v29 }
 0x1fe   : > { %3421 = vmatmul.mubr.msk.f32.vlgmr.msra.gmra.mrb[0].mxu1 %vm535_vm1, %v775_v30 }
 0x1ff   : > { %3747 = vmatpush3.bf16.msra.mxu1 %v4242_v9  ;;  %3442 = vmatprep.mubr.msk.f32.mxu1 %vm4081_vm0, %v4082_v10 }
 0x200   : > { %3748 = vmatprep.subr.bf16.mxu1 %v4080_v7 }
 0x203   : > { %3750 = vmatpush3.bf16.msra.mxu1 %v4258_v14 }
 0x204   : > { %3757 = vmatprep.subr.bf16.mxu1 %v4080_v7 }
 0x2d1   : > { %v844_v31 = vpop.f32.mrb[0].mxu1 }
 0x2d2   : > { %v849_v32 = vrot.slane %v844_v31, 6  ;;  %v3422_v33 = vpop.f32.mrb[1].mxu1 }
 0x2d4   : > { %v851_v34 = vadd.f32 %v849_v32, %v4283_v20 }
 0x2d6   : > { %3947 = vtanh.f32 %v851_v34 }
 0x2e0   : > { %v3948_v35 = vpop.eup %3947 }
 0x2e1   : > { %v854_v37 = vrot.slane %v3948_v35, 2  ;;  %v1879_v38 = vsel %vm1878_vm3, %v1877_v36, %v3948_v35 }
 0x2e3   : > { %3432 = vmatmul.mubr.msk.f32.vlgmr.msra.gmra.mrb[6].mxu0 %vm535_vm1, %v854_v37 }
 0x2e4   : > { %3753 = vmatpush3.bf16.msra.mxu0 %v4242_v9  ;;  %3453 = vmatprep.mubr.msk.f32.mxu0 %vm4081_vm0, %v4082_v10 }
 0x2e5   : > { %3754 = vmatprep.subr.bf16.mxu0 %v4080_v7 }
 0x2e8   : > { %3756 = vmatpush3.bf16.msra.mxu0 %v4258_v14 }
 0x2e9   : > { %3763 = vmatprep.subr.bf16.mxu0 %v4080_v7 }
 0x3b6   : > { %v923_v39 = vpop.f32.mrb[6].mxu0 }
 0x3b7   : > { %v928_v40 = vrot.slane %v923_v39, 5  ;;  %v3433_v41 = vpop.f32.mrb[7].mxu0 }
 0x3b9   : > { %v930_v42 = vadd.f32 %v928_v40, %v4283_v20 }
 0x3bb   : > { %3949 = vtanh.f32 %v930_v42 }
 0x3c5   : > { %v3950_v43 = vpop.eup %3949 }
 0x3c6   : > { %v933_v44 = vrot.slane %v3950_v43, 3  ;;  %v1881_v45 = vsel %vm1880_vm4, %v1879_v38, %v3950_v43 }
 0x3c8   : > { %3443 = vmatmul.mubr.msk.f32.vlgmr.msra.gmra.mrb[2].mxu1 %vm535_vm1, %v933_v44 }
 0x3c9   : > { %3759 = vmatpush3.bf16.msra.mxu1 %v4242_v9  ;;  %3464 = vmatprep.mubr.msk.f32.mxu1 %vm4081_vm0, %v4082_v10 }
 0x3ca   : > { %3760 = vmatprep.subr.bf16.mxu1 %v4080_v7 }
 0x3cd   : > { %3762 = vmatpush3.bf16.msra.mxu1 %v4258_v14 }
 0x3ce   : > { %3769 = vmatprep.subr.bf16.mxu1 %v4080_v7 }
 0x49b   : > { %v1002_v46 = vpop.f32.mrb[2].mxu1 }
 0x49c   : > { %v1007_v47 = vrot.slane %v1002_v46, 4  ;;  %v3444_v48 = vpop.f32.mrb[3].mxu1 }
 0x49e   : > { %v1009_v49 = vadd.f32 %v1007_v47, %v4283_v20 }
 0x4a0   : > { %3951 = vtanh.f32 %v1009_v49 }
 0x4aa   : > { %v3952_v50 = vpop.eup %3951 }
 0x4ab   : > { %v1012_v51 = vrot.slane %v3952_v50, 4  ;;  %v1883_v52 = vsel %vm1882_vm5, %v1881_v45, %v3952_v50 }
 0x4ad   : > { %3454 = vmatmul.mubr.msk.f32.vlgmr.msra.gmra.mrb[8].mxu0 %vm535_vm1, %v1012_v51 }
 0x4ae   : > { %3765 = vmatpush3.bf16.msra.mxu0 %v4242_v9  ;;  %3475 = vmatprep.mubr.msk.f32.mxu0 %vm4081_vm0, %v4082_v10 }
 0x4af   : > { %3766 = vmatprep.subr.bf16.mxu0 %v4080_v7 }
 0x4b2   : > { %3768 = vmatpush3.bf16.msra.mxu0 %v4258_v14 }
 0x4b3   : > { %3775 = vmatprep.subr.bf16.mxu0 %v4080_v7 }
 0x580   : > { %v1081_v53 = vpop.f32.mrb[8].mxu0 }
 0x581   : > { %v1086_v54 = vrot.slane %v1081_v53, 3  ;;  %v3455_v55 = vpop.f32.mrb[9].mxu0 }
 0x583   : > { %v1088_v56 = vadd.f32 %v1086_v54, %v4283_v20 }
 0x585   : > { %3953 = vtanh.f32 %v1088_v56 }
 0x58f   : > { %v3954_v57 = vpop.eup %3953 }
 0x590   : > { %v1091_v58 = vrot.slane %v3954_v57, 5  ;;  %v1885_v59 = vsel %vm1884_vm6, %v1883_v52, %v3954_v57 }
 0x592   : > { %3465 = vmatmul.mubr.msk.f32.vlgmr.msra.gmra.mrb[4].mxu1 %vm535_vm1, %v1091_v58 }
 0x593   : > { %3771 = vmatpush3.bf16.msra.mxu1 %v4242_v9  ;;  %3486 = vmatprep.mubr.msk.f32.mxu1 %vm4081_vm0, %v4082_v10 }
 0x594   : > { %3772 = vmatprep.subr.bf16.mxu1 %v4080_v7 }
 0x597   : > { %3774 = vmatpush3.bf16.msra.mxu1 %v4258_v14 }
 0x598   : > { %3781 = vmatprep.subr.bf16.mxu1 %v4080_v7 }
 0x665   : > { %v1160_v60 = vpop.f32.mrb[4].mxu1 }
 0x666   : > { %v1165_v61 = vrot.slane %v1160_v60, 2  ;;  %v3466_v62 = vpop.f32.mrb[5].mxu1  ;;  %v1898_v60 = vld [vmem:[%s4672_s7 + $0x8] sm:$0xff] }
 0x668   : > { %v1167_v63 = vadd.f32 %v1165_v61, %v4283_v20  ;;  %v1981_v61 = vld [vmem:[%s4673_s8] sm:$0xff] }
 0x66a   : > { %3955 = vtanh.f32 %v1167_v63  ;;  %v1982_v63 = vld [vmem:[%s4673_s8 + $0x8] sm:$0xff] }
 0x674   : > { %v3956_v0 = vpop.eup %3955 }
 0x675   : > { %v1170_v1 = vrot.slane %v3956_v0, 6  ;;  %v1887_v2 = vsel %vm1886_vm7, %v1885_v59, %v3956_v0  ;;  %v1897_v59 = vld [vmem:[%s4672_s7] sm:$0xff]  ;;  %v1899_v0 = vld [vmem:[%s4672_s7 + $0x10] sm:$0xff] }
 0x676   : > { %v3818_v62 = vpack.c.bf16 %v1898_v60, %v1897_v59 }
 0x677   : > { %3476 = vmatmul.mubr.msk.f32.vlgmr.msra.gmra.mrb[10].mxu0 %vm535_vm1, %v1170_v1  ;;  %v1900_v1 = vld [vmem:[%s4672_s7 + $0x18] sm:$0xff] }
 0x678   : > { %3777 = vmatpush3.bf16.msra.mxu0 %v4242_v9  ;;  %3497 = vmatprep.mubr.msk.f32.mxu0 %vm4081_vm0, %v4082_v10 }
 0x679   : > { %3778 = vmatprep.subr.bf16.mxu0 %v4080_v7 }
 0x67c   : > { %3780 = vmatpush3.bf16.msra.mxu0 %v4258_v14 }
 0x67d   : > { %3787 = vmatprep.subr.bf16.mxu0 %v4080_v7 }
 0x74a   : > { %v1239_v3 = vpop.f32.mrb[10].mxu0 }
 0x74b   : > { %v1244_v4 = vrot.slane %v1239_v3, 1  ;;  %v3477_v5 = vpop.f32.mrb[11].mxu0  ;;  %v1983_v3 = vld [vmem:[%s4673_s8 + $0x10] sm:$0xff] }
 0x74c   : > { %v3821_v5 = vpack.c.bf16 %v1900_v1, %v1899_v0 }
 0x74d   : > { %v1246_v6 = vadd.f32 %v1244_v4, %v4283_v20  ;;  %v1984_v4 = vld [vmem:[%s4673_s8 + $0x18] sm:$0xff] }
 0x74f   : > { %3957 = vtanh.f32 %v1246_v6  ;;  %v4447_v6 = vpack.c.bf16 %v1984_v4, %v1983_v3  ;;  %v523_v4 = vld [vmem:[%s4668_s3] sm:$0xf] }
 0x759   : > { %v3958_v8 = vpop.eup %3957 }
 0x75a   : > { %v1249_v11 = vrot.slane %v3958_v8, 7  ;;  %v4349_v12 = vsel %vm1888_vm8, %v1887_v2, %v3958_v8  ;;  %v4433_v2 = vpack.c.bf16 %v1982_v63, %v1981_v61  ;;  %v522_v8 = vld [vmem:[%s507_s30] sm:$0xff] }
 0x75c   : > { %3487 = vmatmul.mubr.msk.f32.vlgmr.msra.gmra.mrb[6].mxu1 %vm535_vm1, %v1249_v11 }
 0x75d   : > { %3783 = vmatpush3.bf16.msra.mxu1 %v4242_v9  ;;  %3508 = vmatprep.mubr.msk.f32.mxu1 %vm4081_vm0, %v4082_v10 }
 0x75e   : > { %3784 = vmatprep.subr.bf16.mxu1 %v4080_v7 }
 0x761   : > { %3786 = vmatpush3.bf16.msra.mxu1 %v4258_v14 }
 0x762   : > { %3793 = vmatprep.subr.bf16.mxu1 %v4080_v7 }
 0x82f   : > { %v1318_v13 = vpop.f32.mrb[6].mxu1 }
 0x830   : > { %v1322_v15 = vadd.f32 %v1318_v13, %v4281_v18  ;;  %v3488_v16 = vpop.f32.mrb[7].mxu1 }
 0x832   : > { %3959 = vtanh.f32 %v1322_v15 }
 0x83c   : > { %v3960_v17 = vpop.eup %3959 }
 0x83d   : > { %3498 = vmatmul.mubr.msk.f32.vlgmr.msra.gmra.mrb[12].mxu0 %vm535_vm1, %v3960_v17 }
 0x83e   : > { %3789 = vmatpush3.bf16.msra.mxu0 %v4242_v9  ;;  %3519 = vmatprep.mubr.msk.f32.mxu0 %vm4081_vm0, %v4082_v10 }
 0x83f   : > { %3790 = vmatprep.subr.bf16.mxu0 %v4080_v7 }
 0x842   : > { %3792 = vmatpush3.bf16.msra.mxu0 %v4258_v14 }
 0x843   : > { %3799 = vmatprep.subr.bf16.mxu0 %v4080_v7 }
 0x910   : > { %v1393_v19 = vpop.f32.mrb[12].mxu0 }
 0x911   : > { %v1398_v20 = vrot.slane %v1393_v19, 7  ;;  %v3499_v21 = vpop.f32.mrb[13].mxu0 }
 0x913   : > { %v1400_v22 = vadd.f32 %v1398_v20, %v4281_v18 }
 0x915   : > { %3961 = vtanh.f32 %v1400_v22 }
 0x91f   : > { %v3962_v23 = vpop.eup %3961 }
 0x920   : > { %v1403_v24 = vrot.slane %v3962_v23, 1  ;;  %v1890_v30 = vsel %vm1876_vm2, %v3960_v17, %v3962_v23 }
 0x922   : > { %3509 = vmatmul.mubr.msk.f32.vlgmr.msra.gmra.mrb[8].mxu1 %vm535_vm1, %v1403_v24 }
 0x923   : > { %3795 = vmatpush3.bf16.msra.mxu1 %v4242_v9  ;;  %3530 = vmatprep.mubr.msk.f32.mxu1 %vm4081_vm0, %v4082_v10 }
 0x924   : > { %3796 = vmatprep.subr.bf16.mxu1 %v4080_v7 }
 0x927   : > { %3798 = vmatpush3.bf16.msra.mxu1 %v4258_v14 }
 0x928   : > { %3805 = vmatprep.subr.bf16.mxu1 %v4080_v7 }
 0x9f5   : > { %v1472_v25 = vpop.f32.mrb[8].mxu1 }
 0x9f6   : > { %v1477_v26 = vrot.slane %v1472_v25, 6  ;;  %v3510_v27 = vpop.f32.mrb[9].mxu1 }
 0x9f8   : > { %v1479_v28 = vadd.f32 %v1477_v26, %v4281_v18 }
 0x9fa   : > { %3963 = vtanh.f32 %v1479_v28 }
 0xa04   : > { %v3964_v29 = vpop.eup %3963 }
 0xa05   : > { %v1482_v31 = vrot.slane %v3964_v29, 2  ;;  %v1891_v32 = vsel %vm1878_vm3, %v1890_v30, %v3964_v29 }
 0xa07   : > { %3520 = vmatmul.mubr.msk.f32.vlgmr.msra.gmra.mrb[14].mxu0 %vm535_vm1, %v1482_v31 }
 0xa08   : > { %3801 = vmatpush3.bf16.msra.mxu0 %v4242_v9  ;;  %3541 = vmatprep.mubr.msk.f32.mxu0 %vm4081_vm0, %v4082_v10 }
 0xa09   : > { %3802 = vmatprep.subr.bf16.mxu0 %v4080_v7 }
 0xa0c   : > { %3804 = vmatpush3.bf16.msra.mxu0 %v4258_v14 }
 0xa0d   : > { %3811 = vmatprep.subr.bf16.mxu0 %v4080_v7 }
 0xada   : > { %v1551_v33 = vpop.f32.mrb[14].mxu0 }
 0xadb   : > { %v1556_v34 = vrot.slane %v1551_v33, 5  ;;  %v3521_v35 = vpop.f32.mrb[15].mxu0 }
 0xadd   : > { %v1558_v36 = vadd.f32 %v1556_v34, %v4281_v18 }
 0xadf   : > { %3965 = vtanh.f32 %v1558_v36 }
 0xae9   : > { %v3966_v37 = vpop.eup %3965 }
 0xaea   : > { %v1561_v38 = vrot.slane %v3966_v37, 3  ;;  %v1892_v39 = vsel %vm1880_vm4, %v1891_v32, %v3966_v37 }
 0xaec   : > { %3531 = vmatmul.mubr.msk.f32.vlgmr.msra.gmra.mrb[10].mxu1 %vm535_vm1, %v1561_v38 }
 0xaed   : > { %3807 = vmatpush3.bf16.msra.mxu1 %v4242_v9  ;;  %3552 = vmatprep.mubr.msk.f32.mxu1 %vm4081_vm0, %v4082_v10 }
 0xaee   : > { %3808 = vmatprep.subr.bf16.mxu1 %v4080_v7 }
 0xaf1   : > { %3810 = vmatpush3.bf16.msra.mxu1 %v4258_v14 }
 0xaf2   : > { %3817 = vmatprep.subr.bf16.mxu1 %v4080_v7 }
 0xbbf   : > { %v1630_v40 = vpop.f32.mrb[10].mxu1 }
 0xbc0   : > { %v1635_v41 = vrot.slane %v1630_v40, 4  ;;  %v3532_v42 = vpop.f32.mrb[11].mxu1 }
 0xbc2   : > { %v1637_v43 = vadd.f32 %v1635_v41, %v4281_v18 }
 0xbc4   : > { %3967 = vtanh.f32 %v1637_v43 }
 0xbce   : > { %v3968_v44 = vpop.eup %3967 }
 0xbcf   : > { %v1640_v45 = vrot.slane %v3968_v44, 4  ;;  %v1893_v46 = vsel %vm1882_vm5, %v1892_v39, %v3968_v44 }
 0xbd1   : > { %3542 = vmatmul.mubr.msk.f32.vlgmr.msra.gmra.mrb[16].mxu0 %vm535_vm1, %v1640_v45 }
 0xbd2   : > { %3813 = vmatpush3.bf16.msra.mxu0 %v4242_v9  ;;  %3563 = vmatprep.mubr.msk.f32.mxu0 %vm4081_vm0, %v4082_v10 }
 0xbd3   : > { %3814 = vmatprep.subr.bf16.mxu0 %v4080_v7 }
 0xbd6   : > { %3816 = vmatpush3.bf16.msra.mxu0 %v4258_v14 }
 0xbd7   : > { %3823 = vmatprep.subr.bf16.mxu0 %v4080_v7 }
 0xca4   : > { %v1709_v47 = vpop.f32.mrb[16].mxu0 }
 0xca5   : > { %v1714_v48 = vrot.slane %v1709_v47, 3  ;;  %v3543_v49 = vpop.f32.mrb[17].mxu0 }
 0xca7   : > { %v1716_v50 = vadd.f32 %v1714_v48, %v4281_v18 }
 0xca9   : > { %3969 = vtanh.f32 %v1716_v50 }
 0xcb3   : > { %v3970_v51 = vpop.eup %3969 }
 0xcb4   : > { %v1719_v52 = vrot.slane %v3970_v51, 5  ;;  %v1894_v53 = vsel %vm1884_vm6, %v1893_v46, %v3970_v51 }
 0xcb6   : > { %3553 = vmatmul.mubr.msk.f32.vlgmr.msra.gmra.mrb[12].mxu1 %vm535_vm1, %v1719_v52 }
 0xcb7   : > { %3574 = vmatprep.mubr.msk.f32.mxu1 %vm4081_vm0, %v4082_v10  ;;  %3819 = vmatpush3.bf16.msra.mxu1 %v3818_v62 }
 0xcb8   : > { %3820 = vmatprep.subr.bf16.mxu1 %v4080_v7 }
 0xcbb   : > { %3822 = vmatpush3.bf16.msra.mxu1 %v3821_v5 }
 0xcbc   : > { %3829 = vmatprep.subr.bf16.mxu1 %v4080_v7 }
 0xcbe   : > { %3575 = vmatmul.mubr.msk.f32.vlgmr.msra.gmra.mrb[14].mxu1 %vm535_vm1, %v522_v8 }
 0xcbf   : > { %3831 = vmatpush3.bf16.msra.mxu1 %v4433_v2  ;;  %3596 = vmatprep.mubr.msk.f32.mxu1 %vm4081_vm0, %v4082_v10 }
 0xcc0   : > { %3832 = vmatprep.subr.bf16.mxu1 %v4080_v7 }
 0xcc3   : > { %3834 = vmatpush3.bf16.msra.mxu1 %v4447_v6 }
 0xcc4   : > { %3841 = vmatprep.subr.bf16.mxu1 %v4080_v7 }
 0xd89   : > { %v1788_v9 = vpop.f32.mrb[12].mxu1 }
 0xd8a   : > { %v1793_v14 = vrot.slane %v1788_v9, 2  ;;  %v3554_v54 = vpop.f32.mrb[13].mxu1 }
 0xd8c   : > { %v1795_v55 = vadd.f32 %v1793_v14, %v4281_v18 }
 0xd8e   : > { %3971 = vtanh.f32 %v1795_v55 }
 0xd98   : > { %v3972_v56 = vpop.eup %3971 }
 0xd99   : > { %v1798_v57 = vrot.slane %v3972_v56, 6  ;;  %v1895_v58 = vsel %vm1886_vm7, %v1894_v53, %v3972_v56 }
 0xd9b   : > { %3564 = vmatmul.mubr.msk.f32.vlgmr.msra.gmra.mrb[18].mxu0 %vm535_vm1, %v1798_v57 }
 0xd9c   : > { %3585 = vmatprep.mubr.msk.f32.mxu0 %vm4081_vm0, %v4082_v10  ;;  %3825 = vmatpush3.bf16.msra.mxu0 %v4433_v2 }
 0xd9d   : > { %3826 = vmatprep.subr.bf16.mxu0 %v4080_v7 }
 0xda0   : > { %3828 = vmatpush3.bf16.msra.mxu0 %v4447_v6 }
 0xda1   : > { %3835 = vmatprep.subr.bf16.mxu0 %v4080_v7 }
 0xe6e   : > { %v1867_v11 = vpop.f32.mrb[18].mxu0 }
 0xe6f   : > { %v1872_v13 = vrot.slane %v1867_v11, 1  ;;  %v3565_v15 = vpop.f32.mrb[19].mxu0 }
 0xe71   : > { %v1874_v16 = vadd.f32 %v1872_v13, %v4281_v18  ;;  %v1977_v18 = vpop.f32.mrb[14].mxu1 }
 0xe72   : > { %v3576_v22 = vpop.f32.mrb[15].mxu1 }
 0xe73   : > { %3973 = vtanh.f32 %v1874_v16  ;;  %v2704_v16 = vlaneseq }
 0xe7d   : > { %v3974_v17 = vpop.eup %3973 }
 0xe7e   : > { %v1986_v19 = vrot.slane %v3974_v17, 7  ;;  %v1896_v20 = vsel %vm1888_vm8, %v1895_v58, %v3974_v17  ;;  %v2705_v17 = vand.u32 127, %v2704_v16 }
 0xe7f   : > { %v4463_v21 = vpack.c.bf16 %v1896_v20, %v4349_v12  ;;  %v3203_v12 = vld [vmem:[%s4674_s9] ss:$0 sm:$0xff] }
 0xe80   : > { %3586 = vmatmul.mubr.msk.f32.vlgmr.msra.gmra.mrb[20].mxu0 %vm535_vm1, %v1986_v19  ;;  %v4475_v23 = vadd.f32 %v3203_v12, %v1977_v18  ;;  %v2707_v19 = vstv %s2706_s21  ;;  %s3222_s21 = sshll.u32 %s4192_s26, 4 }
 0xe81   : > { %3837 = vmatpush3.bf16.msra.mxu0 %v4433_v2  ;;  %3607 = vmatprep.mubr.msk.f32.mxu0 %vm4081_vm0, %v4082_v10  ;;  %vm2708_vm12 = vcmp.lt.s32.totalorder %v2705_v17, %v2707_v19  ;;  %s4622_s30 = scalar_lea.hbm %s4680_s15, %s3222_s21 }
 0xe82   : > { %3838 = vmatprep.subr.bf16.mxu0 %v4080_v7 }
 0xe85   : > { %3840 = vmatpush3.bf16.msra.mxu0 %v4447_v6 }
 0xe86   : > { %3847 = vmatprep.subr.bf16.mxu0 %v4080_v7 }
 0xf53   : > { %v2055_v24 = vpop.f32.mrb[20].mxu0 }
 0xf54   : > { %v2059_v25 = vadd.f32 %v2055_v24, %v4475_v23  ;;  %v3587_v26 = vpop.f32.mrb[21].mxu0 }
 0xf56   : > { %3975 = vtanh.f32 %v2059_v25 }
 0xf60   : > { %v3976_v27 = vpop.eup %3975 }
 0xf61   : > { %3597 = vmatmul.mubr.msk.f32.vlgmr.msra.gmra.mrb[16].mxu1 %vm535_vm1, %v3976_v27 }
 0xf62   : > { %3843 = vmatpush3.bf16.msra.mxu1 %v4433_v2  ;;  %3618 = vmatprep.mubr.msk.f32.mxu1 %vm4081_vm0, %v4082_v10 }
 0xf63   : > { %3844 = vmatprep.subr.bf16.mxu1 %v4080_v7 }
 0xf66   : > { %3846 = vmatpush3.bf16.msra.mxu1 %v4447_v6 }
 0xf67   : > { %3853 = vmatprep.subr.bf16.mxu1 %v4080_v7 }
0x1034   : > { %v2130_v28 = vpop.f32.mrb[16].mxu1 }
0x1035   : > { %v2135_v29 = vrot.slane %v2130_v28, 7  ;;  %v3598_v30 = vpop.f32.mrb[17].mxu1 }
0x1037   : > { %v2137_v31 = vadd.f32 %v2135_v29, %v4475_v23 }
0x1039   : > { %3977 = vtanh.f32 %v2137_v31 }
0x1043   : > { %v3978_v32 = vpop.eup %3977 }
0x1044   : > { %v2140_v33 = vrot.slane %v3978_v32, 1  ;;  %v2613_v39 = vsel %vm1876_vm2, %v3976_v27, %v3978_v32 }
0x1046   : > { %3608 = vmatmul.mubr.msk.f32.vlgmr.msra.gmra.mrb[22].mxu0 %vm535_vm1, %v2140_v33 }
0x1047   : > { %3849 = vmatpush3.bf16.msra.mxu0 %v4433_v2  ;;  %3629 = vmatprep.mubr.msk.f32.mxu0 %vm4081_vm0, %v4082_v10 }
0x1048   : > { %3850 = vmatprep.subr.bf16.mxu0 %v4080_v7 }
0x104b   : > { %3852 = vmatpush3.bf16.msra.mxu0 %v4447_v6 }
0x104c   : > { %3859 = vmatprep.subr.bf16.mxu0 %v4080_v7 }
0x1119   : > { %v2209_v34 = vpop.f32.mrb[22].mxu0 }
0x111a   : > { %v2214_v35 = vrot.slane %v2209_v34, 6  ;;  %v3609_v36 = vpop.f32.mrb[23].mxu0 }
0x111c   : > { %v2216_v37 = vadd.f32 %v2214_v35, %v4475_v23 }
0x111e   : > { %3979 = vtanh.f32 %v2216_v37 }
0x1128   : > { %v3980_v38 = vpop.eup %3979 }
0x1129   : > { %v2219_v40 = vrot.slane %v3980_v38, 2  ;;  %v2614_v41 = vsel %vm1878_vm3, %v2613_v39, %v3980_v38 }
0x112b   : > { %3619 = vmatmul.mubr.msk.f32.vlgmr.msra.gmra.mrb[18].mxu1 %vm535_vm1, %v2219_v40 }
0x112c   : > { %3855 = vmatpush3.bf16.msra.mxu1 %v4433_v2  ;;  %3640 = vmatprep.mubr.msk.f32.mxu1 %vm4081_vm0, %v4082_v10 }
0x112d   : > { %3856 = vmatprep.subr.bf16.mxu1 %v4080_v7 }
0x1130   : > { %3858 = vmatpush3.bf16.msra.mxu1 %v4447_v6 }
0x1131   : > { %3865 = vmatprep.subr.bf16.mxu1 %v4080_v7 }
0x11fe   : > { %v2288_v42 = vpop.f32.mrb[18].mxu1 }
0x11ff   : > { %v2293_v43 = vrot.slane %v2288_v42, 5  ;;  %v3620_v44 = vpop.f32.mrb[19].mxu1  ;;  %v2900_v42 = vld [vmem:[%s4675_s10 + $0x8] sm:$0xff] }
0x1201   : > { %v2295_v45 = vadd.f32 %v2293_v43, %v4475_v23  ;;  %v2901_v43 = vld [vmem:[%s4675_s10 + $0x10] sm:$0xff] }
0x1203   : > { %3981 = vtanh.f32 %v2295_v45  ;;  %v2902_v45 = vld [vmem:[%s4675_s10 + $0x18] sm:$0xff] }
0x120d   : > { %v3982_v46 = vpop.eup %3981 }
0x120e   : > { %v2298_v47 = vrot.slane %v3982_v46, 3  ;;  %v2615_v48 = vsel %vm1880_vm4, %v2614_v41, %v3982_v46  ;;  %v2899_v41 = vld [vmem:[%s4675_s10] sm:$0xff]  ;;  %v3882_v46 = vpack.c.bf16 %v2902_v45, %v2901_v43 }
0x120f   : > { %v3879_v44 = vpack.c.bf16 %v2900_v42, %v2899_v41 }
0x1210   : > { %3630 = vmatmul.mubr.msk.f32.vlgmr.msra.gmra.mrb[24].mxu0 %vm535_vm1, %v2298_v47  ;;  %v2904_v47 = vld [vmem:[%s4675_s10 + $0x28] sm:$0xff] }
0x1211   : > { %3861 = vmatpush3.bf16.msra.mxu0 %v4433_v2  ;;  %3651 = vmatprep.mubr.msk.f32.mxu0 %vm4081_vm0, %v4082_v10 }
0x1212   : > { %3862 = vmatprep.subr.bf16.mxu0 %v4080_v7 }
0x1215   : > { %3864 = vmatpush3.bf16.msra.mxu0 %v4447_v6 }
0x1216   : > { %3871 = vmatprep.subr.bf16.mxu0 %v4080_v7 }
0x12e3   : > { %v2367_v49 = vpop.f32.mrb[24].mxu0 }
0x12e4   : > { %v2372_v50 = vrot.slane %v2367_v49, 4  ;;  %v3631_v51 = vpop.f32.mrb[25].mxu0  ;;  %v2905_v49 = vld [vmem:[%s4675_s10 + $0x30] sm:$0xff] }
0x12e6   : > { %v2374_v52 = vadd.f32 %v2372_v50, %v4475_v23  ;;  %v2906_v50 = vld [vmem:[%s4675_s10 + $0x38] sm:$0xff] }
0x12e7   : > { %v3888_v51 = vpack.c.bf16 %v2906_v50, %v2905_v49 }
0x12e8   : > { %3983 = vtanh.f32 %v2374_v52  ;;  %v2907_v52 = vld [vmem:[%s4675_s10 + $0x40] sm:$0xff] }
0x12f2   : > { %v3984_v53 = vpop.eup %3983 }
0x12f3   : > { %v2377_v9 = vrot.slane %v3984_v53, 4  ;;  %v2616_v14 = vsel %vm1882_vm5, %v2615_v48, %v3984_v53  ;;  %v2908_v53 = vld [vmem:[%s4675_s10 + $0x48] sm:$0xff] }
0x12f5   : > { %3641 = vmatmul.mubr.msk.f32.vlgmr.msra.gmra.mrb[20].mxu1 %vm535_vm1, %v2377_v9  ;;  %v3891_v9 = vpack.c.bf16 %v2908_v53, %v2907_v52 }
0x12f6   : > { %3867 = vmatpush3.bf16.msra.mxu1 %v4433_v2  ;;  %3662 = vmatprep.mubr.msk.f32.mxu1 %vm4081_vm0, %v4082_v10 }
0x12f7   : > { %3868 = vmatprep.subr.bf16.mxu1 %v4080_v7 }
0x12fa   : > { %3870 = vmatpush3.bf16.msra.mxu1 %v4447_v6 }
0x12fb   : > { %3875 = vmatprep.subr.bf16.mxu1 %v4080_v7 }
0x13c8   : > { %v2446_v54 = vpop.f32.mrb[20].mxu1 }
0x13c9   : > { %v2451_v55 = vrot.slane %v2446_v54, 3  ;;  %v3642_v56 = vpop.f32.mrb[21].mxu1  ;;  %v2909_v54 = vld [vmem:[%s4675_s10 + $0x50] sm:$0xff] }
0x13cb   : > { %v2453_v57 = vadd.f32 %v2451_v55, %v4475_v23  ;;  %v2910_v55 = vld [vmem:[%s4675_s10 + $0x58] sm:$0xff] }
0x13cd   : > { %3985 = vtanh.f32 %v2453_v57  ;;  %v3894_v57 = vpack.c.bf16 %v2910_v55, %v2909_v54 }
0x13d7   : > { %v3986_v58 = vpop.eup %3985 }
0x13d8   : > { %v2456_v59 = vrot.slane %v3986_v58, 5  ;;  %v2617_v60 = vsel %vm1884_vm6, %v2616_v14, %v3986_v58 }
0x13da   : > { %3652 = vmatmul.mubr.msk.f32.vlgmr.msra.gmra.mrb[26].mxu0 %vm535_vm1, %v2456_v59 }
0x13db   : > { %3874 = vmatpush3.bf16.xpose.msk.msra.mxu0 %vm3873_vm9, %v4463_v21  ;;  %3671 = vmatprep.mubr.msk.f32.mxu0 %vm4081_vm0, %v4082_v10 }
0x13dc   : > { %3669 = vmatprep.subr.mxu0 %v4082_v10 }
0x13e3   : > { %3670 = vmatpush3.xpose.msk.msra.mxu0 %vm535_vm1, %v523_v4 }
0x14ad   : > { %v2525_v61 = vpop.f32.mrb[26].mxu0 }
0x14ae   : > { %v2530_v62 = vrot.slane %v2525_v61, 2  ;;  %v3653_v63 = vpop.f32.mrb[27].mxu0 }
0x14b0   : > { %v2532_v0 = vadd.f32 %v2530_v62, %v4475_v23 }
0x14b2   : > { %3987 = vtanh.f32 %v2532_v0 }
0x14bc   : > { %v3988_v1 = vpop.eup %3987 }
0x14bd   : > { %v2535_v2 = vrot.slane %v3988_v1, 6  ;;  %v2618_v3 = vsel %vm1886_vm7, %v2617_v60, %v3988_v1 }
0x14bf   : > { %3663 = vmatmul.mubr.msk.f32.vlgmr.msra.gmra.mrb[22].mxu1 %vm535_vm1, %v2535_v2 }
0x14c0   : > { %3877 = vmatpush3.bf16.msra.mxu1 %v4463_v21  ;;  %3678 = vmatprep.mubr.msk.f32.mxu1 %vm4081_vm0, %v4082_v10 }
0x14c1   : > { %3681 = vmatprep.subr.mxu1 %v4082_v10 }
0x1592   : > { %v2604_v5 = vpop.f32.mrb[22].mxu1 }
0x1593   : > { %v2609_v6 = vrot.slane %v2604_v5, 1  ;;  %v3664_v8 = vpop.f32.mrb[23].mxu1 }
0x1595   : > { %v2611_v11 = vadd.f32 %v2609_v6, %v4475_v23 }
0x1597   : > { %3989 = vtanh.f32 %v2611_v11 }
0x15a1   : > { %v3990_v13 = vpop.eup %3989 }
0x15a2   : > { %v2619_v15 = vsel %vm1888_vm8, %v2618_v3, %v3990_v13  ;;  %2621 = vst.msk [vmem:[%s4546_s27 - $0x7] sm:$0x80] %vm2620_vm10, %v3990_v13 }
0x15a3   : > { %3672 = vmatmul.mubr.msk.f32.vlgmr.msra.gmra.mrb[28].mxu0 %vm535_vm1, %v2619_v15 }
0x1676   : > { %v2700_v20 = vpop.f32.mrb[28].mxu0 }
0x1677   : > { %v3673_v21 = vpop.f32.mrb[29].mxu0  ;;  %v2723_v18 = vsel %vm2722_vm11, %v2700_v20, -inf  ;;  %v2709_v22 = vsel %vm2708_vm12, %v2700_v20, -1e+30 }
0x1678   : > { %2724 = vmax.xlane.f32.xlu0 %v2723_v18  ;;  %v2711_v12 = vsel %vm2710_vm13, %v2709_v22, -inf }
0x1679   : > { %2712 = vmax.xlane.f32.xlu1 %v2711_v12 }
0x1705   : > { %v2725_v23 = vpop.xlane.xlu0 %2724 }
0x1706   : > { %v2726_v24 = vsub.f32 %v2700_v20, %v2725_v23  ;;  %v2713_v27 = vpop.xlane.xlu1 %2712 }
0x1707   : > { %v2714_v28 = vsub.f32 %v2709_v22, %v2713_v27 }
0x1708   : > { %v2727_v25 = vmul.f32 1.442695, %v2726_v24 }
0x1709   : > { %v2715_v29 = vmul.f32 1.442695, %v2714_v28 }
0x170a   : > { %3991 = vpow2.f32 %v2727_v25 }
0x170b   : > { %3993 = vpow2.f32 %v2715_v29 }
0x1714   : > { %v3992_v26 = vpop.eup %3991 }
0x1715   : > { %2730 = vrot.lane.b32.xlu0 %v3992_v26, %s4083_s29  ;;  %v3994_v32 = vpop.eup %3993 }
0x1716   : > { %v2717_v33 = vsel %vm2710_vm13, %v3994_v32, 0.0 }
0x1719   : > { %2889 = vrot.lane.b32.xlu0 %v2619_v15, %s4084_s1 }
0x1787   : > { %v2731_v30 = vpop.permute.xlu0 %2730 }
0x1788   : > { %v2734_v31 = vsel %vm2733_vm14, %v2731_v30, 0.0 }
0x1789   : > { %2735 = vadd.xlane.f32.xlu1 %v2734_v31 }
0x178b   : > { %v2890_v60 = vpop.permute.xlu0 %2889 }
0x178d   : > { %2718 = vadd.xlane.f32.xlu1 %v2717_v33 }
0x1816   : > { %v2736_v34 = vpop.xlane.xlu1 %2735 }
0x1817   : > { %3995 = vrcp.f32 %v2736_v34 }
0x181a   : > { %v2719_v35 = vpop.xlane.xlu1 %2718 }
0x181b   : > { %3997 = vrcp.f32 %v2719_v35 }
0x1821   : > { %v3996_v36 = vpop.eup %3995 }
0x1822   : > { %v2738_v37 = vmul.f32 %v3996_v36, %v3992_v26 }
0x1824   : > { %2813 = vrot.lane.b32.xlu1 %v2738_v37, %s4083_s29  ;;  %s3036_s29 = sshll.u32 %s4546_s27, 4  ;;  %s3037_s29 = int_to_ptr.vmem [resolvable:$true] %s3036_s29 }
0x1825   : > { %v3998_v38 = vpop.eup %3997 }
0x1826   : > { %v2721_v39 = vmul.f32 %v3998_v38, %v3994_v32 }
0x1828   : > { %2999 = vst.msk [vmem:[%s515_s20] sm:$0xff] %vm2710_vm13, %v2721_v39  ;;  %3679 = vmatmul.mubr.msk.f32.vlgmr.msra.gmra.mrb[24].mxu1 %vm2710_vm13, %v2721_v39  ;;  %s3015_s20 = scalar_lea.sflag [#allocation5], %s497_s22 }
0x1829   : > { %3682 = vmatpush3.msk.msra.mxu1 %vm1882_vm5, %v523_v4  ;;  %3683 = vmatprep.mubr.msk.f32.mxu1 %vm4081_vm0, %v4082_v10 }
0x182a   : > { %3878 = vmatprep.subr.bf16.mxu1 %v4080_v7 }
0x1896   : > { %v2814_v40 = vpop.permute.xlu1 %2813 }
0x1897   : > { %3001 = vst.msk [vmem:[%s519_s16] sm:$0xff] %vm2733_vm14, %v2814_v40  ;;  %3684 = vmatmul.mubr.msk.f32.vlgmr.msra.gmra.mrb[26].mxu1 %vm2733_vm14, %v2814_v40  ;;  %s4017_s16 = sshll.u32 %s4086_s28, 4  ;;  %s4018_s16 = int_to_ptr.vmem [resolvable:$false] %s4017_s16 }
0x1898   : > { %3710 = vmatprep.mubr.msk.f32.mxu1 %vm4081_vm0, %v4082_v10  ;;  %3880 = vmatpush3.bf16.msra.mxu1 %v3879_v44  ;;  %v2903_v10 = vld [vmem:[%s4675_s10 + $0x20] sm:$0xff]  ;;  %vm2918_vm0 = vcmask 785408   ;;  %s4019_s2 = scalar_lea.vmem %s4018_s16, 32  ;;  %p4020_p5 = scmp.lt.s32.totalorder %s3037_s29, %s4018_s16 }
0x1899   : > { %3881 = vmatprep.subr.bf16.mxu1 %v4080_v7  ;;  %v3885_v48 = vpack.c.bf16 %v2904_v47, %v2903_v10 }
0x189c   : > { %3883 = vmatpush3.bf16.msra.mxu1 %v3882_v46 }
0x189d   : > { %3884 = vmatprep.subr.bf16.mxu1 %v4080_v7 }
0x18a0   : > { %3886 = vmatpush3.bf16.msra.mxu1 %v3885_v48 }
0x18a1   : > { %3887 = vmatprep.subr.bf16.mxu1 %v4080_v7 }
0x18a4   : > { %3889 = vmatpush3.bf16.msra.mxu1 %v3888_v51 }
0x18a5   : > { %3890 = vmatprep.subr.bf16.mxu1 %v4080_v7 }
0x18a8   : > { %3892 = vmatpush3.bf16.msra.mxu1 %v3891_v9 }
0x18a9   : > { %3893 = vmatprep.subr.bf16.mxu1 %v4080_v7  ;;  %v3220_v7 = vld [vmem:[%s4676_s11] ss:$0 sm:$0xff] }
0x18ac   : > { %3895 = vmatpush3.bf16.msra.mxu1 %v3894_v57 }
0x18fb   : > { %v2808_v14 = vpop.f32.mrb[24].mxu1 }
0x18fc   : > { %v3680_v56 = vpop.f32.mrb[25].mxu1  ;;  %v2896_v61 = vsel %vm535_vm1, %v2808_v14, %v2890_v60 }
0x196a   : > { %v2885_v58 = vpop.f32.mrb[26].mxu1 }
0x196b   : > { %2893 = vrot.lane.b32.xlu1 %v2885_v58, %s4085_s0  ;;  %v3685_v59 = vpop.f32.mrb[27].mxu1  ;;  %s4013_s0 = scalar_lea.vmem %s3037_s29, 16 }
0x196c   : > { %p4014_p2 = scmp.ne.s32.totalorder %s3037_s29, %s4013_s0  ;;  %p4021_p6 = scmp.lt.s32.totalorder %s4019_s2, %s4013_s0 }
0x196e   : > { %p4015_p3 = pnand %p4014_p2, %p4209_p10  ;;  %p4022_p7 = por %p4021_p6, %p4020_p5 }
0x1970   : > { %p4016_p4 = pneg %p4015_p3 }
0x1972   : > { %p4023_p8 = pnand %p4022_p7, %p4016_p4 }
0x19dd   : > { %v2894_v62 = vpop.permute.xlu1 %2893 }
0x19de   : > { %v2898_v63 = vsel %vm2897_vm15, %v2896_v61, %v2894_v62 }
0x19df   : > { %3711 = vmatmul.mubr.msk.f32.vlgmr.msra.gmra.mrb[28].mxu1 %vm2918_vm0, %v2898_v63 }
0x1ab2   : > { %v2988_v0 = vpop.f32.mrb[28].mxu1 }
0x1ab3   : > { %v2989_v1 = vadd.f32 %v3220_v7, %v2988_v0  ;;  %v3712_v2 = vpop.f32.mrb[29].mxu1 }
0x1ab5   : > { %3999 = vtanh.f32 %v2989_v1 }
0x1ab6   : > { %4026 = shalt.err (!%p4023_p8)
}
0x1ab7   : > { %s4027_s26 = scalar_lea.hbm %s4622_s30, 16  ;;  %s4031_s21 = scalar_lea.hbm %s4680_s15, 32 }
0x1ab8   : > { %p4028_p9 = scmp.ne.s32.totalorder %s4622_s30, %s4027_s26  ;;  %p4032_p0 = scmp.lt.u32.totalorder %s4622_s30, %s4680_s15 }
0x1ab9   : > { %p4033_p1 = scmp.lt.u32.totalorder %s4031_s21, %s4027_s26  ;;  %p4035_p3 = scmp.lt.u32.totalorder %s4027_s26, %s4622_s30 }
0x1aba   : > { %p4029_p12 = pnand %p4028_p9, %p4209_p10 }
0x1abb   : > { %p4034_p2 = por %p4033_p1, %p4032_p0 }
0x1abc   : > { %p4030_p13 = pneg %p4029_p12 }
0x1abd   : > { %p4036_p4 = por %p4035_p3, %p4034_p2 }
0x1abf   : > { %p4037_p5 = pnand %p4036_p4, %p4030_p13 }
0x1ac1   : > { %4040 = shalt.err (!%p4037_p5)
}
0x1ac2   : > { %3896 = dma.vmem_to_hbm [thread:$0]  (%p4209_p10), %s3037_s29, 16, %s4622_s30, %s3015_s20   ;;  %v4000_v3 = vpop.eup %3999 }
0x1ac3   : > { %s4087_s2 = smov 96   ;;  %s511_s16 = scalar_lea.vmem %s4677_s12, %s4422_s19 }
0x1ac4   : > { %2994 = vrot.lane.b32.xlu0 %v4000_v3, %s4087_s2 }
0x1b36   : > { %v2995_v4 = vpop.permute.xlu0 %2994 }
0x1b37   : > { %v2997_v5 = vadd.f32 %v4000_v3, %v2995_v4 }
0x1b39   : > { %2998 = vst.msk [vmem:[%s511_s16] sm:$0xff] %vm535_vm1, %v2997_v5 }
0x1b3a PF: > { %p3902_p6 = scmp.ge.s32.totalorder %s4077_s25, 2  ;;  %s3069_s17 = sand.u32 1, %s4065_s23  }
0x1b3b   : > { %s3070_s29 = scalar_lea.sflag [#allocation5], %s3069_s17 }
0x1b3c   : > { %p3899_p7 = pnand %p3902_p6, %p4213_p11 }
0x1b3e   : > { %4060 = dma.done.wait (!%p3899_p7), %s3070_s29, 16  }
0x1b3f   : > { %4062 = vsyncadd (!%p3899_p7), %s3070_s29, 4294967280  ;;  %s4695_s25 = sld [smem:[#allocation9_spill]]  ;;  %s4696_s30 = sld [smem:[#allocation8_spill]] }
0x1b40   : > { %s4697_s0 = sld [smem:[#allocation10_spill]]  ;;  %s4698_s23 = smov %s4069_s24 }
0x1b45   : > { %p32_p10 = scmp.ge.s32.totalorder %s4695_s25, 4   ;;  %s4699_s24 = smov %s4696_s30 }
0x1b47   :  { %34 = sbr.rel (!%p32_p10) target bundleno = 19 (0x13), region = 138 }
0x1b4e   :  { %3074 = vsyncpa [#allocation5], 1 }
0x1b4f   :  { %3076 = vsyncpa [#allocation5 + $0x1], 1 }

</bundles_post_ra>
